<compile_context>
chip_gen: v6e
topology: v6e:2x2x1
jax: 0.10.0
libtpu: 0.0.40
codegen_flags: <defaults>
</compile_context>

<pallas_src>
import functools

import jax
import jax.numpy as jnp
from jax.experimental import pallas as pl
from jax.experimental.pallas import tpu as pltpu

# ---- hyperparameters (MultiTaskVATLoss.__init__) ----
VAT_TYPE = (0, 1)        # 0 = regression task, 1 = classification task
WEIGHT   = (0.3, 0.7)
VAR = 0.1
XI  = 10.0
EPS = 1.0
IP  = 1

REG_OUT  = 8             # regression head output dim
CLS_OUT  = 8             # number of classes
HEAD_OUT = REG_OUT + CLS_OUT     # 16 real output columns
OUT_PAD  = 128                   # lane-dense padded output width (unmasked vst)


# ------------------------ tiling helpers ------------------------

def _batch_tile(B, D):
    """Batch tile: multiple of 8 when possible, sized so each streamed (TB, D)
    f32 block stays around 8 MiB -> double-buffered x+d blocks plus the fused
    weight fit comfortably in v7x's 64 MiB VMEM (and trivially in v5e/v6e)."""
    max_rows = max(8, (8 * 1024 * 1024) // (D * 4))
    tb = min(B, 256, max_rows)
    if B < 8:
        return B
    tb = max(8, (tb // 8) * 8)
    while tb > 8 and B % tb:
        tb -= 8
    return tb if B % tb == 0 else B


def _vmem_limit(tb, D):
    # 2 streamed (tb, D) inputs x 2 buffers + fused weight/bias + outputs + slack
    need = 2 * 2 * tb * D * 4 + 2 * D * OUT_PAD * 4 + 4 * tb * OUT_PAD * 4
    need += 4 * 1024 * 1024
    return int(min(max(need, 16 * 1024 * 1024), 60 * 1024 * 1024))


# ======================= Pallas kernels =======================

def _fwd_kernel(x_ref, w_ref, b_ref, o_ref):
    # One lane-dense (TB, 128) MXU matmul covers BOTH heads:
    # cols 0:8 = regression head, cols 8:16 = classification head, rest zero.
    o_ref[...] = (jnp.dot(x_ref[...], w_ref[...],
                          preferred_element_type=jnp.float32) + b_ref[...])


def model_forward_pallas(x_flat, w_fused, b_fused):
    B, D = x_flat.shape
    tb = _batch_tile(B, D)
    nb = B // tb
    cost = pl.CostEstimate(
        flops=2 * B * D * OUT_PAD,
        transcendentals=0,
        bytes_accessed=4 * (B * D + D * OUT_PAD + OUT_PAD + B * OUT_PAD))
    return pl.pallas_call(
        _fwd_kernel,
        grid=(nb,),
        in_specs=[pl.BlockSpec((tb, D), lambda i: (i, 0)),
                  pl.BlockSpec((D, OUT_PAD), lambda i: (0, 0)),
                  pl.BlockSpec((1, OUT_PAD), lambda i: (0, 0))],
        out_specs=pl.BlockSpec((tb, OUT_PAD), lambda i: (i, 0)),
        out_shape=jax.ShapeDtypeStruct((B, OUT_PAD), jnp.float32),
        compiler_params=pltpu.CompilerParams(
            dimension_semantics=("parallel",),
            vmem_limit_bytes=_vmem_limit(tb, D)),
        cost_estimate=cost,
    )(x_flat, w_fused, b_fused)


def _l2norm_kernel(d_ref, o_ref):
    # torch _l2_normalize: d / (||d_b||_2 + 1e-8), per-sample norm over all
    # flattened features.  Reciprocal goes to the (otherwise idle) EUP slot.
    d = d_ref[...]
    nrm = jnp.sqrt(jnp.sum(d * d, axis=1, keepdims=True))
    o_ref[...] = d * pl.reciprocal(nrm + 1e-8, approx=True)


def l2_normalize_pallas(d_flat):
    B, D = d_flat.shape
    tb = _batch_tile(B, D)
    nb = B // tb
    cost = pl.CostEstimate(flops=3 * B * D, transcendentals=2 * B,
                           bytes_accessed=8 * B * D)
    return pl.pallas_call(
        _l2norm_kernel,
        grid=(nb,),
        in_specs=[pl.BlockSpec((tb, D), lambda i: (i, 0))],
        out_specs=pl.BlockSpec((tb, D), lambda i: (i, 0)),
        out_shape=jax.ShapeDtypeStruct((B, D), jnp.float32),
        compiler_params=pltpu.CompilerParams(
            dimension_semantics=("parallel",),
            vmem_limit_bytes=_vmem_limit(tb, D)),
        cost_estimate=cost,
    )(d_flat)


def _lds_kernel(x_ref, g_ref, pred_ref, w_ref, b_ref, o_ref, *, batch):
    # Fully fused LDS evaluation for one batch tile:
    #   r_adv = eps * _l2_normalize(d.grad)
    #   pred_hat = model(x + r_adv)           (single lane-dense MXU matmul)
    #   lds += weighted multi-task distance(pred_hat, pred_clean)
    i = pl.program_id(0)

    g = g_ref[...]
    nrm = jnp.sqrt(jnp.sum(g * g, axis=1, keepdims=True))
    r_adv = g * (EPS * pl.reciprocal(nrm + 1e-8, approx=True))

    z = (jnp.dot(x_ref[...] + r_adv, w_ref[...],
                 preferred_element_type=jnp.float32) + b_ref[...])
    pred = pred_ref[...]

    # task 0 (vat_type==0): kldiv_gaussian = mean((mu1-mu2)^2 / (2*var))
    diff = z[:, 0:REG_OUT] - pred[:, 0:REG_OUT]
    reg_sum = jnp.sum(diff * diff) / (2.0 * VAR)          # sum over tile

    # task 1 (vat_type==1): F.kl_div(log_softmax(pred_hat,1), softmax(pred,1),
    #                                reduction='batchmean')
    pc = z[:, REG_OUT:HEAD_OUT]
    tc = pred[:, REG_OUT:HEAD_OUT]
    zp = pc - jnp.max(pc, axis=1, keepdims=True)
    logp_hat = zp - jnp.log(jnp.sum(jnp.exp(zp), axis=1, keepdims=True))
    zt = tc - jnp.max(tc, axis=1, keepdims=True)
    logp_tar = zt - jnp.log(jnp.sum(jnp.exp(zt), axis=1, keepdims=True))
    prob_tar = jnp.exp(logp_tar)
    kl_sum = jnp.sum(prob_tar * (logp_tar - logp_hat))    # sum over tile

    contrib = (WEIGHT[0] * reg_sum / float(batch * REG_OUT)
               + WEIGHT[1] * kl_sum / float(batch))

    @pl.when(i == 0)
    def _():
        o_ref[...] = jnp.zeros_like(o_ref)

    o_ref[...] = o_ref[...] + jnp.broadcast_to(contrib, (1, 1))


def lds_pallas(x_flat, g_flat, pred_full, w_fused, b_fused):
    B, D = x_flat.shape
    tb = _batch_tile(B, D)
    nb = B // tb
    cost = pl.CostEstimate(
        flops=2 * B * D * OUT_PAD + 8 * B * D,
        transcendentals=B * (4 * CLS_OUT + 2),
        bytes_accessed=4 * (2 * B * D + D * OUT_PAD + B * OUT_PAD))
    out = pl.pallas_call(
        functools.partial(_lds_kernel, batch=B),
        grid=(nb,),
        in_specs=[pl.BlockSpec((tb, D), lambda i: (i, 0)),
                  pl.BlockSpec((tb, D), lambda i: (i, 0)),
                  pl.BlockSpec((tb, OUT_PAD), lambda i: (i, 0)),
                  pl.BlockSpec((D, OUT_PAD), lambda i: (0, 0)),
                  pl.BlockSpec((1, OUT_PAD), lambda i: (0, 0))],
        # scalar accumulator block revisited every tile -> "arbitrary" axis
        out_specs=pl.BlockSpec((1, 1), lambda i: (0, 0)),
        out_shape=jax.ShapeDtypeStruct((1, 1), jnp.float32),
        compiler_params=pltpu.CompilerParams(
            dimension_semantics=("arbitrary",),
            vmem_limit_bytes=_vmem_limit(tb, D)),
        cost_estimate=cost,
    )(x_flat, g_flat, pred_full, w_fused, b_fused)
    return out[0, 0]


# ============ pure-JAX mirror (only for the d.grad step) ============
# Kept in f32 to stay bit-close to the Pallas forward (no bf16 cast anywhere).

def _model_ref(x_flat, params):
    wr, br, wc, bc = params
    return x_flat @ wr + br, x_flat @ wc + bc


def _distance_ref(pred_hat, pred):
    (pr, pc), (tr, tc) = pred_hat, pred
    reg_term = jnp.mean((pr - tr) ** 2 / (2.0 * VAR))
    logp_hat = jax.nn.log_softmax(pc, axis=1)
    logp_tar = jax.nn.log_softmax(tc, axis=1)
    prob_tar = jnp.exp(logp_tar)
    kl_term = jnp.sum(prob_tar * (logp_tar - logp_hat)) / pc.shape[0]
    return WEIGHT[0] * reg_term + WEIGHT[1] * kl_term


# ======================= VAT loss forward =======================

def multi_task_vat_loss(params, x, key):
    """Equivalent of MultiTaskVATLoss.forward(model, x)."""
    wr, br, wc, bc = params
    B = x.shape[0]
    x_flat = x.reshape(B, -1).astype(jnp.float32)
    D = x_flat.shape[1]

    # fused, lane-padded two-head parameters (reg cols 0:8, cls cols 8:16)
    w_fused = jnp.zeros((D, OUT_PAD), jnp.float32)
    w_fused = w_fused.at[:, :REG_OUT].set(wr).at[:, REG_OUT:HEAD_OUT].set(wc)
    b_fused = jnp.zeros((1, OUT_PAD), jnp.float32)
    b_fused = b_fused.at[:, :REG_OUT].set(br).at[:, REG_OUT:HEAD_OUT].set(bc)

    # 1) clean prediction under torch.no_grad()  (single fused Pallas matmul)
    pred_full = jax.lax.stop_gradient(
        model_forward_pallas(x_flat, w_fused, b_fused))
    pred = (pred_full[:, :REG_OUT], pred_full[:, REG_OUT:HEAD_OUT])

    # 2) random direction d ~ U[0,1) - 0.5, per-sample L2 normalized (Pallas)
    d = jax.random.uniform(key, (B, D), dtype=jnp.float32) - 0.5
    d_cur = l2_normalize_pallas(d)

    # 3) power iteration for the adversarial direction.
    #    (no BatchNorm in the synthetic model, so _disable_tracking_bn_stats
    #     is a no-op)
    # TODO(synk): adv_distance.backward() (d.grad) is taken with jax.grad over
    # the pure-JAX mirror above; pallas_call has no autodiff rule here.
    def adv_distance(dd):
        pred_hat = _model_ref(x_flat + XI * dd, params)
        return _distance_ref(pred_hat, pred)

    g = d_cur
    for it in range(IP):
        g = jax.grad(adv_distance)(d_cur)          # d.grad
        if it + 1 < IP:
            d_cur = l2_normalize_pallas(g)         # _l2_normalize(d.grad)

    # 4) LDS at the adversarial perturbation: l2-normalize(d.grad) * eps,
    #    the perturbed forward and the multi-task distance are ONE fused
    #    Pallas kernel emitting the scalar directly.
    lds = lds_pallas(x_flat, g, pred_full, w_fused, b_fused)
    return lds


# ============================ main ============================

if __name__ == "__main__":
    key = jax.random.PRNGKey(0)
    k_x, k_d, k_wr, k_br, k_wc, k_bc = jax.random.split(key, 6)

    B, C, H, W = 2, 4, 16, 16
    D = C * H * W

    x = jax.random.normal(k_x, (B, C, H, W), dtype=jnp.float32)

    # deterministic synthetic "model" parameters
    wr = 0.02 * jax.random.normal(k_wr, (D, REG_OUT), dtype=jnp.float32)
    br = 0.10 * jax.random.normal(k_br, (1, REG_OUT), dtype=jnp.float32)
    wc = 0.02 * jax.random.normal(k_wc, (D, CLS_OUT), dtype=jnp.float32)
    bc = 0.10 * jax.random.normal(k_bc, (1, CLS_OUT), dtype=jnp.float32)
    params = (wr, br, wc, bc)

    lds = jax.jit(multi_task_vat_loss)(params, x, k_d)
    jax.block_until_ready(lds)
    assert lds.shape == () and jnp.isfinite(lds)
    print("KERNEL_OK")
</pallas_src>

<mosaic_0001>
module attributes {stable_mosaic.version = 11 : i64} {
  func.func @_fwd_kernel(%arg0: i32, %arg1: memref<2x1024xf32, #tpu.memory_space<vmem>>, %arg2: memref<1024x128xf32, #tpu.memory_space<vmem>>, %arg3: memref<1x128xf32, #tpu.memory_space<vmem>>, %arg4: memref<2x128xf32, #tpu.memory_space<vmem>>) attributes {dimension_semantics = [#tpu.dimension_semantics<parallel>], iteration_bounds = array<i64: 1>, scalar_prefetch = 0 : i64, scratch_operands = 0 : i64, tpu.core_type = #tpu.core_type<tc>, window_params = [{transform_indices = @transform_0, window_bounds = array<i64: 2, 1024>}, {pipeline_mode = #tpu.pipeline_mode<synchronous>, transform_indices = @transform_1, window_bounds = array<i64: 1024, 128>}, {pipeline_mode = #tpu.pipeline_mode<synchronous>, transform_indices = @transform_2, window_bounds = array<i64: 1, 128>}, {transform_indices = @transform_3, window_bounds = array<i64: 2, 128>}]} {
    %c0 = arith.constant 0 : index
    %c0_0 = arith.constant 0 : index
    %0 = vector.load %arg1[%c0, %c0_0] : memref<2x1024xf32, #tpu.memory_space<vmem>>, vector<2x1024xf32>
    %c0_1 = arith.constant 0 : index
    %c0_2 = arith.constant 0 : index
    %1 = vector.load %arg2[%c0_1, %c0_2] : memref<1024x128xf32, #tpu.memory_space<vmem>>, vector<1024x128xf32>
    %cst = arith.constant dense<0.000000e+00> : vector<2x128xf32>
    %2 = tpu.matmul %0, %1, %cst {dimension_numbers = #tpu.dot_dimension_numbers<[1], [0], [0], [1], [0, 0, 1, 1], [], []>} : vector<2x1024xf32>, vector<1024x128xf32>, vector<2x128xf32> -> vector<2x128xf32>
    %c0_3 = arith.constant 0 : index
    %c0_4 = arith.constant 0 : index
    %3 = vector.load %arg3[%c0_3, %c0_4] : memref<1x128xf32, #tpu.memory_space<vmem>>, vector<1x128xf32>
    %4 = vector.broadcast %3 : vector<1x128xf32> to vector<2x128xf32>
    %5 = arith.addf %2, %4 : vector<2x128xf32>
    %c0_5 = arith.constant 0 : index
    %c0_6 = arith.constant 0 : index
    %6 = vector.load %arg4[%c0_5, %c0_6] : memref<2x128xf32, #tpu.memory_space<vmem>>, vector<2x128xf32>
    tpu.vector_store %arg4[%c0_5, %c0_6], %5 {strides = array<i32>} : memref<2x128xf32, #tpu.memory_space<vmem>>, vector<2x128xf32>,
    return
  }
  func.func @transform_0(%arg0: i32) -> (i32, i32) {
    %c0_i32 = arith.constant 0 : i32
    %c0_i32_0 = arith.constant 0 : i32
    return %arg0, %c0_i32 : i32, i32
  }
  func.func @transform_1(%arg0: i32) -> (i32, i32) {
    %c0_i32 = arith.constant 0 : i32
    %c0_i32_0 = arith.constant 0 : i32
    %c0_i32_1 = arith.constant 0 : i32
    return %c0_i32, %c0_i32_0 : i32, i32
  }
  func.func @transform_2(%arg0: i32) -> (i32, i32) {
    %c0_i32 = arith.constant 0 : i32
    %c0_i32_0 = arith.constant 0 : i32
    %c0_i32_1 = arith.constant 0 : i32
    return %c0_i32, %c0_i32_0 : i32, i32
  }
  func.func @transform_3(%arg0: i32) -> (i32, i32) {
    %c0_i32 = arith.constant 0 : i32
    %c0_i32_0 = arith.constant 0 : i32
    return %arg0, %c0_i32 : i32, i32
  }
}

module attributes {stable_mosaic.version = 11 : i64} {
  func.func @_l2norm_kernel(%arg0: i32, %arg1: memref<2x1024xf32, #tpu.memory_space<vmem>>, %arg2: memref<2x1024xf32, #tpu.memory_space<vmem>>) attributes {dimension_semantics = [#tpu.dimension_semantics<parallel>], iteration_bounds = array<i64: 1>, scalar_prefetch = 0 : i64, scratch_operands = 0 : i64, tpu.core_type = #tpu.core_type<tc>, window_params = [{transform_indices = @transform_0, window_bounds = array<i64: 2, 1024>}, {transform_indices = @transform_1, window_bounds = array<i64: 2, 1024>}]} {
    %c0 = arith.constant 0 : index
    %c0_0 = arith.constant 0 : index
    %0 = vector.load %arg1[%c0, %c0_0] : memref<2x1024xf32, #tpu.memory_space<vmem>>, vector<2x1024xf32>
    %1 = arith.mulf %0, %0 : vector<2x1024xf32>
    %cst = arith.constant dense<0.000000e+00> : vector<2xf32>
    %2 = vector.multi_reduction <add>, %1, %cst [1] : vector<2x1024xf32> to vector<2xf32>
    %3 = vector.shape_cast %2 : vector<2xf32> to vector<2x1xf32>
    %4 = math.sqrt %3 : vector<2x1xf32>
    %cst_1 = arith.constant 9.99999993E-9 : f32
    %5 = vector.broadcast %cst_1 : f32 to vector<2x1xf32>
    %6 = arith.addf %4, %5 : vector<2x1xf32>
    %7 = tpu.reciprocal %6 {approx = true} : vector<2x1xf32> -> vector<2x1xf32>
    %8 = vector.broadcast %7 : vector<2x1xf32> to vector<2x1024xf32>
    %9 = arith.mulf %0, %8 : vector<2x1024xf32>
    %c0_2 = arith.constant 0 : index
    %c0_3 = arith.constant 0 : index
    %10 = vector.load %arg2[%c0_2, %c0_3] : memref<2x1024xf32, #tpu.memory_space<vmem>>, vector<2x1024xf32>
    tpu.vector_store %arg2[%c0_2, %c0_3], %9 {strides = array<i32>} : memref<2x1024xf32, #tpu.memory_space<vmem>>, vector<2x1024xf32>,
    return
  }
  func.func @transform_0(%arg0: i32) -> (i32, i32) {
    %c0_i32 = arith.constant 0 : i32
    %c0_i32_0 = arith.constant 0 : i32
    return %arg0, %c0_i32 : i32, i32
  }
  func.func @transform_1(%arg0: i32) -> (i32, i32) {
    %c0_i32 = arith.constant 0 : i32
    %c0_i32_0 = arith.constant 0 : i32
    return %arg0, %c0_i32 : i32, i32
  }
}

module attributes {stable_mosaic.version = 11 : i64} {
  func.func @_lds_kernel(%arg0: i32, %arg1: memref<2x1024xf32, #tpu.memory_space<vmem>>, %arg2: memref<2x1024xf32, #tpu.memory_space<vmem>>, %arg3: memref<2x128xf32, #tpu.memory_space<vmem>>, %arg4: memref<1024x128xf32, #tpu.memory_space<vmem>>, %arg5: memref<1x128xf32, #tpu.memory_space<vmem>>, %arg6: memref<1x1xf32, #tpu.memory_space<vmem>>) attributes {dimension_semantics = [#tpu.dimension_semantics<arbitrary>], iteration_bounds = array<i64: 1>, scalar_prefetch = 0 : i64, scratch_operands = 0 : i64, tpu.core_type = #tpu.core_type<tc>, window_params = [{transform_indices = @transform_0, window_bounds = array<i64: 2, 1024>}, {transform_indices = @transform_1, window_bounds = array<i64: 2, 1024>}, {transform_indices = @transform_2, window_bounds = array<i64: 2, 128>}, {pipeline_mode = #tpu.pipeline_mode<synchronous>, transform_indices = @transform_3, window_bounds = array<i64: 1024, 128>}, {pipeline_mode = #tpu.pipeline_mode<synchronous>, transform_indices = @transform_4, window_bounds = array<i64: 1, 128>}, {pipeline_mode = #tpu.pipeline_mode<synchronous>, transform_indices = @transform_5, window_bounds = array<i64: 1, 1>}]} {
    %c0 = arith.constant 0 : index
    %c0_0 = arith.constant 0 : index
    %0 = vector.load %arg2[%c0, %c0_0] : memref<2x1024xf32, #tpu.memory_space<vmem>>, vector<2x1024xf32>
    %1 = arith.mulf %0, %0 : vector<2x1024xf32>
    %cst = arith.constant dense<0.000000e+00> : vector<2xf32>
    %2 = vector.multi_reduction <add>, %1, %cst [1] : vector<2x1024xf32> to vector<2xf32>
    %3 = vector.shape_cast %2 : vector<2xf32> to vector<2x1xf32>
    %4 = math.sqrt %3 : vector<2x1xf32>
    %cst_1 = arith.constant 9.99999993E-9 : f32
    %5 = vector.broadcast %cst_1 : f32 to vector<2x1xf32>
    %6 = arith.addf %4, %5 : vector<2x1xf32>
    %7 = tpu.reciprocal %6 {approx = true} : vector<2x1xf32> -> vector<2x1xf32>
    %cst_2 = arith.constant 1.000000e+00 : f32
    %8 = vector.broadcast %cst_2 : f32 to vector<2x1xf32>
    %9 = arith.mulf %8, %7 : vector<2x1xf32>
    %10 = vector.broadcast %9 : vector<2x1xf32> to vector<2x1024xf32>
    %11 = arith.mulf %0, %10 : vector<2x1024xf32>
    %c0_3 = arith.constant 0 : index
    %c0_4 = arith.constant 0 : index
    %12 = vector.load %arg1[%c0_3, %c0_4] : memref<2x1024xf32, #tpu.memory_space<vmem>>, vector<2x1024xf32>
    %13 = arith.addf %12, %11 : vector<2x1024xf32>
    %c0_5 = arith.constant 0 : index
    %c0_6 = arith.constant 0 : index
    %14 = vector.load %arg4[%c0_5, %c0_6] : memref<1024x128xf32, #tpu.memory_space<vmem>>, vector<1024x128xf32>
    %cst_7 = arith.constant dense<0.000000e+00> : vector<2x128xf32>
    %15 = tpu.matmul %13, %14, %cst_7 {dimension_numbers = #tpu.dot_dimension_numbers<[1], [0], [0], [1], [0, 0, 1, 1], [], []>} : vector<2x1024xf32>, vector<1024x128xf32>, vector<2x128xf32> -> vector<2x128xf32>
    %c0_8 = arith.constant 0 : index
    %c0_9 = arith.constant 0 : index
    %16 = vector.load %arg5[%c0_8, %c0_9] : memref<1x128xf32, #tpu.memory_space<vmem>>, vector<1x128xf32>
    %17 = vector.broadcast %16 : vector<1x128xf32> to vector<2x128xf32>
    %18 = arith.addf %15, %17 : vector<2x128xf32>
    %c0_10 = arith.constant 0 : index
    %c0_11 = arith.constant 0 : index
    %19 = vector.load %arg3[%c0_10, %c0_11] : memref<2x128xf32, #tpu.memory_space<vmem>>, vector<2x128xf32>
    %20 = vector.extract_strided_slice %18 {offsets = [0, 0], sizes = [2, 8], strides = [1, 1]} : vector<2x128xf32> to vector<2x8xf32>
    %21 = vector.extract_strided_slice %19 {offsets = [0, 0], sizes = [2, 8], strides = [1, 1]} : vector<2x128xf32> to vector<2x8xf32>
    %22 = arith.subf %20, %21 : vector<2x8xf32>
    %23 = arith.mulf %22, %22 : vector<2x8xf32>
    %24 = vector.shape_cast %23 : vector<2x8xf32> to vector<1x2x8xf32>
    %cst_12 = arith.constant dense<0.000000e+00> : vector<1xf32>
    %25 = vector.multi_reduction <add>, %24, %cst_12 [1, 2] : vector<1x2x8xf32> to vector<1xf32>
    %26 = vector.shape_cast %25 : vector<1xf32> to vector<1x1x1xf32>
    %27 = vector.extract %26[0, 0, 0] : f32 from vector<1x1x1xf32>
    %cst_13 = arith.constant 2.000000e-01 : f32
    %28 = arith.divf %27, %cst_13 : f32
    %29 = vector.extract_strided_slice %18 {offsets = [0, 8], sizes = [2, 8], strides = [1, 1]} : vector<2x128xf32> to vector<2x8xf32>
    %30 = vector.extract_strided_slice %19 {offsets = [0, 8], sizes = [2, 8], strides = [1, 1]} : vector<2x128xf32> to vector<2x8xf32>
    %cst_14 = arith.constant dense<0xFF800000> : vector<2xf32>
    %31 = vector.multi_reduction <maximumf>, %29, %cst_14 [1] : vector<2x8xf32> to vector<2xf32>
    %32 = vector.shape_cast %31 : vector<2xf32> to vector<2x1xf32>
    %33 = vector.broadcast %32 : vector<2x1xf32> to vector<2x8xf32>
    %34 = arith.subf %29, %33 : vector<2x8xf32>
    %35 = math.exp %34 : vector<2x8xf32>
    %cst_15 = arith.constant dense<0.000000e+00> : vector<2xf32>
    %36 = vector.multi_reduction <add>, %35, %cst_15 [1] : vector<2x8xf32> to vector<2xf32>
    %37 = vector.shape_cast %36 : vector<2xf32> to vector<2x1xf32>
    %38 = math.log %37 : vector<2x1xf32>
    %39 = vector.broadcast %38 : vector<2x1xf32> to vector<2x8xf32>
    %40 = arith.subf %34, %39 : vector<2x8xf32>
    %cst_16 = arith.constant dense<0xFF800000> : vector<2xf32>
    %41 = vector.multi_reduction <maximumf>, %30, %cst_16 [1] : vector<2x8xf32> to vector<2xf32>
    %42 = vector.shape_cast %41 : vector<2xf32> to vector<2x1xf32>
    %43 = vector.broadcast %42 : vector<2x1xf32> to vector<2x8xf32>
    %44 = arith.subf %30, %43 : vector<2x8xf32>
    %45 = math.exp %44 : vector<2x8xf32>
    %cst_17 = arith.constant dense<0.000000e+00> : vector<2xf32>
    %46 = vector.multi_reduction <add>, %45, %cst_17 [1] : vector<2x8xf32> to vector<2xf32>
    %47 = vector.shape_cast %46 : vector<2xf32> to vector<2x1xf32>
    %48 = math.log %47 : vector<2x1xf32>
    %49 = vector.broadcast %48 : vector<2x1xf32> to vector<2x8xf32>
    %50 = arith.subf %44, %49 : vector<2x8xf32>
    %51 = math.exp %50 : vector<2x8xf32>
    %52 = arith.subf %50, %40 : vector<2x8xf32>
    %53 = arith.mulf %51, %52 : vector<2x8xf32>
    %54 = vector.shape_cast %53 : vector<2x8xf32> to vector<1x2x8xf32>
    %cst_18 = arith.constant dense<0.000000e+00> : vector<1xf32>
    %55 = vector.multi_reduction <add>, %54, %cst_18 [1, 2] : vector<1x2x8xf32> to vector<1xf32>
    %56 = vector.shape_cast %55 : vector<1xf32> to vector<1x1x1xf32>
    %57 = vector.extract %56[0, 0, 0] : f32 from vector<1x1x1xf32>
    %cst_19 = arith.constant 3.000000e-01 : f32
    %58 = arith.mulf %cst_19, %28 : f32
    %cst_20 = arith.constant 1.600000e+01 : f32
    %59 = arith.divf %58, %cst_20 : f32
    %cst_21 = arith.constant 0.699999988 : f32
    %60 = arith.mulf %cst_21, %57 : f32
    %cst_22 = arith.constant 2.000000e+00 : f32
    %61 = arith.divf %60, %cst_22 : f32
    %62 = arith.addf %59, %61 : f32
    %c0_i32 = arith.constant 0 : i32
    %63 = arith.cmpi eq, %arg0, %c0_i32 : i32
    %64 = arith.extui %63 : i1 to i32
    %c0_i32_23 = arith.constant 0 : i32
    %65 = arith.cmpi ne, %64, %c0_i32_23 : i32
    scf.if %65 {
      %cst_28 = arith.constant 0.000000e+00 : f32
      %70 = vector.broadcast %cst_28 : f32 to vector<1x1xf32>
      %c0_29 = arith.constant 0 : index
      %c0_30 = arith.constant 0 : index
      %71 = vector.load %arg6[%c0_29, %c0_30] : memref<1x1xf32, #tpu.memory_space<vmem>>, vector<1x1xf32>
      tpu.vector_store %arg6[%c0_29, %c0_30], %70 {strides = array<i32>} : memref<1x1xf32, #tpu.memory_space<vmem>>, vector<1x1xf32>,
    } else {
    }
    %c0_24 = arith.constant 0 : index
    %c0_25 = arith.constant 0 : index
    %66 = vector.load %arg6[%c0_24, %c0_25] : memref<1x1xf32, #tpu.memory_space<vmem>>, vector<1x1xf32>
    %67 = vector.broadcast %62 : f32 to vector<1x1xf32>
    %68 = arith.addf %66, %67 : vector<1x1xf32>
    %c0_26 = arith.constant 0 : index
    %c0_27 = arith.constant 0 : index
    %69 = vector.load %arg6[%c0_26, %c0_27] : memref<1x1xf32, #tpu.memory_space<vmem>>, vector<1x1xf32>
    tpu.vector_store %arg6[%c0_26, %c0_27], %68 {strides = array<i32>} : memref<1x1xf32, #tpu.memory_space<vmem>>, vector<1x1xf32>,
    return
  }
  func.func @transform_0(%arg0: i32) -> (i32, i32) {
    %c0_i32 = arith.constant 0 : i32
    %c0_i32_0 = arith.constant 0 : i32
    return %arg0, %c0_i32 : i32, i32
  }
  func.func @transform_1(%arg0: i32) -> (i32, i32) {
    %c0_i32 = arith.constant 0 : i32
    %c0_i32_0 = arith.constant 0 : i32
    return %arg0, %c0_i32 : i32, i32
  }
  func.func @transform_2(%arg0: i32) -> (i32, i32) {
    %c0_i32 = arith.constant 0 : i32
    %c0_i32_0 = arith.constant 0 : i32
    return %arg0, %c0_i32 : i32, i32
  }
  func.func @transform_3(%arg0: i32) -> (i32, i32) {
    %c0_i32 = arith.constant 0 : i32
    %c0_i32_0 = arith.constant 0 : i32
    %c0_i32_1 = arith.constant 0 : i32
    return %c0_i32, %c0_i32_0 : i32, i32
  }
  func.func @transform_4(%arg0: i32) -> (i32, i32) {
    %c0_i32 = arith.constant 0 : i32
    %c0_i32_0 = arith.constant 0 : i32
    %c0_i32_1 = arith.constant 0 : i32
    return %c0_i32, %c0_i32_0 : i32, i32
  }
  func.func @transform_5(%arg0: i32) -> (i32, i32) {
    %c0_i32 = arith.constant 0 : i32
    %c0_i32_0 = arith.constant 0 : i32
    %c0_i32_1 = arith.constant 0 : i32
    return %c0_i32, %c0_i32_0 : i32, i32
  }
}

</mosaic_0001>

<bundles_post_ra>
// kernel: multi_task_vat_loss.4
= control target key start
LH: loop header
LB: loop body
LE: loop exit
PB: predicated region body
PF: predicated region fallthrough
CT: control target
= control target key end

     0   :  { %v18_v0 = vlaneseq  ;;  %v106_v2 = vmov 1983009808   ;;  %vm56_vm0 = vcmask 1041408   ;;  %v107_v42 = vmov 269488144   ;;  %s138_s0 = inlined_call_operand.vmem [shape: f32[2,1024], index: 0, kind: input, shape index: {}]   ;;  %s139_s1 = inlined_call_operand.vmem [shape: f32[2,1024], index: 1, kind: output, shape index: {}]  }
   0x1   :  { %v8_v1 = vld [vmem:[%s138_s0] sm:$0xff]  ;;  %v16_v3 = vunpack.c.l.s4 %v106_v2  ;;  %v9_v4 = vld [vmem:[%s138_s0 + $0x8] sm:$0xff]  ;;  %v85_v43 = vunpack.c.l.s4 %v107_v42 }
   0x2   :  { %v10_v5 = vmul.f32 %v8_v1, %v8_v1  ;;  %v19_v6 = vshrl.u32 %v18_v0, 7  ;;  %v11_v9 = vmul.f32 %v9_v4, %v9_v4 }
   0x3   :  { %v17_v7 = vunpack.c.0.s8 %v16_v3  ;;  %v86_v44 = vunpack.c.0.s8 %v85_v43 }
   0x4   :  { %v14_v8 = vcombine.high %v10_v5, %v10_v5  ;;  %v31_v15 = vcombine.high %v11_v9, %v11_v9 }
   0x5   :  { %v20_v10 = vsub.s32 %v17_v7, %v19_v6  ;;  %v89_v45 = vsub.s32 %v86_v44, %v19_v6 }
   0x7   :  { %v21_v11 = vrot.slane %v10_v5, %v20_v10  ;;  %v28_v12 = vrot.slane %v14_v8, %v20_v10  ;;  %v38_v16 = vrot.slane %v11_v9, %v20_v10  ;;  %v45_v21 = vrot.slane %v31_v15, %v20_v10 }
   0x9   :  { %v29_v13 = vcombine.high %v21_v11, %v21_v11  ;;  %v30_v14 = vcombine.high %v28_v12, %v28_v12  ;;  %v57_v17 = vsel %vm56_vm0, %v21_v11, 0.0  ;;  %v60_v19 = vsel %vm56_vm0, %v28_v12, 0.0 }
   0xa   :  { %v46_v22 = vcombine.high %v38_v16, %v38_v16  ;;  %v64_v25 = vsel %vm56_vm0, %v38_v16, 0.0  ;;  %v47_v27 = vcombine.high %v45_v21, %v45_v21  ;;  %v68_v30 = vsel %vm56_vm0, %v45_v21, 0.0 }
   0xb   :  { %v58_v18 = vsel %vm56_vm0, %v29_v13, 0.0  ;;  %v62_v23 = vsel %vm56_vm0, %v30_v14, 0.0 }
   0xc   :  { %v59_v20 = vadd.f32 %v58_v18, %v57_v17  ;;  %v66_v28 = vsel %vm56_vm0, %v46_v22, 0.0  ;;  %v70_v32 = vsel %vm56_vm0, %v47_v27, 0.0 }
   0xe   :  { %v61_v24 = vadd.f32 %v60_v19, %v59_v20 }
  0x10   :  { %v63_v26 = vadd.f32 %v62_v23, %v61_v24 }
  0x12   :  { %v65_v29 = vadd.f32 %v64_v25, %v63_v26 }
  0x14   :  { %v67_v31 = vadd.f32 %v66_v28, %v65_v29 }
  0x16   :  { %v69_v33 = vadd.f32 %v68_v30, %v67_v31 }
  0x18   :  { %v71_v34 = vadd.f32 %v70_v32, %v69_v33 }
  0x1a   :  { %72 = vadd.xlane.f32.xlu0 %v71_v34 }
  0xa3   :  { %v73_v35 = vpop.xlane.xlu0 %72 }
  0xa4   :  { %102 = vrsqrt.f32 %v73_v35  ;;  %vm76_vm1 = vcmp.eq.f32.partialorder %v73_v35, inf  ;;  %v79_v38 = vand.u32 2147483648, %v73_v35  ;;  %vm78_vm2 = vcmp.eq.f32.partialorder %v73_v35, 0.0 }
  0xb1   :  { %v103_v36 = vpop.eup %102 }
  0xb2   :  { %v75_v37 = vmul.f32 %v103_v36, %v73_v35 }
  0xb4   :  { %v77_v39 = vsel %vm76_vm1, %v73_v35, %v75_v37 }
  0xb5   :  { %v80_v40 = vsel %vm78_vm2, %v79_v38, %v77_v39 }
  0xb6   :  { %v81_v41 = vadd.f32 1e-08, %v80_v40 }
  0xb8   :  { %104 = vrcp.f32 %v81_v41 }
  0xc5   :  { %v105_v46 = vpop.eup %104 }
  0xc6   :  { %v90_v47 = vrot.slane %v105_v46, %v89_v45 }
  0xc8   :  { %v92_v48 = vmul.f32 %v90_v47, %v8_v1  ;;  %v93_v49 = vmul.f32 %v90_v47, %v9_v4 }
  0xca   :  { %94 = vst [vmem:[%s139_s1] sm:$0xff] %v92_v48  ;;  %95 = vst [vmem:[%s139_s1 + $0x8] sm:$0xff] %v93_v49 }

// kernel: div.4
= control target key start
LH: loop header
LB: loop body
LE: loop exit
PB: predicated region body
PF: predicated region fallthrough
CT: control target
= control target key end

     0   :  { %s37_s0 = inlined_call_operand.vmem [shape: f32[2], index: 0, kind: input, shape index: {}]   ;;  %s38_s1 = inlined_call_operand.vmem [shape: f32[2], index: 1, kind: input, shape index: {}]   ;;  %s39_s2 = inlined_call_operand.vmem [shape: f32[2], index: 2, kind: output, shape index: {}]  }
   0x1   :  { %v4_v0 = vld [vmem:[%s38_s1] sm:$0x1] }
   0x2   :  { %11 = vrcp.f32 %v4_v0  ;;  %v3_v1 = vld [vmem:[%s37_s0] sm:$0x1] }
   0xf   :  { %v12_v2 = vpop.eup %11 }
  0x10   :  { %v8_v3 = vmul.f32 %v12_v2, %v3_v1 }
  0x12   :  { %10 = vst [vmem:[%s39_s2] sm:$0x1] %v8_v3 }

// kernel: multi_task_vat_loss.3
= control target key start
LH: loop header
LB: loop body
LE: loop exit
PB: predicated region body
PF: predicated region fallthrough
CT: control target
= control target key end

     0   :  { %v624_v30 = vmov 1983009808   ;;  %v157_v32 = vlaneseq  ;;  %s1047_s1 = inlined_call_operand.vmem [shape: f32[1024,128], index: 1, kind: input, shape index: {}]   ;;  %s1048_s0 = inlined_call_operand.vmem [shape: f32[2,1024], index: 0, kind: input, shape index: {}]   ;;  %s1049_s2 = inlined_call_operand.vmem [shape: f32[1,128], index: 2, kind: input, shape index: {}]   ;;  %s1050_s3 = inlined_call_operand.vmem [shape: f32[2,128], index: 3, kind: output, shape index: {}]  }
   0x1   :  { %v47_v0 = vld [vmem:[%s1047_s1 + $0xf8] sm:$0xff]  ;;  %v46_v4 = vld [vmem:[%s1047_s1 + $0xf0] sm:$0xff]  ;;  %v45_v8 = vld [vmem:[%s1047_s1 + $0xe8] sm:$0xff]  ;;  %v155_v31 = vunpack.c.l.s4 %v624_v30 }
   0x2   :  { %v79_v1 = vld [vmem:[%s1047_s1 + $0x1f8] sm:$0xff]  ;;  %481 = vmatprep.subr.mxu0 %v47_v0  ;;  %v78_v5 = vld [vmem:[%s1047_s1 + $0x1f0] sm:$0xff]  ;;  %v77_v9 = vld [vmem:[%s1047_s1 + $0x1e8] sm:$0xff]  ;;  %v158_v42 = vshrl.u32 %v157_v32, 7 }
   0x3   :  { %v31_v2 = vld [vmem:[%s1047_s1 + $0x78] sm:$0xff]  ;;  %516 = vmatprep.subr.mxu1 %v79_v1  ;;  %v30_v6 = vld [vmem:[%s1047_s1 + $0x70] sm:$0xff]  ;;  %v29_v10 = vld [vmem:[%s1047_s1 + $0x68] sm:$0xff]  ;;  %v156_v41 = vunpack.c.0.s8 %v155_v31 }
   0x4   :  { %v63_v3 = vld [vmem:[%s1047_s1 + $0x178] sm:$0xff]  ;;  %482 = vmatpush3.msra.mxu0 %v31_v2  ;;  %v62_v7 = vld [vmem:[%s1047_s1 + $0x170] sm:$0xff]  ;;  %v61_v11 = vld [vmem:[%s1047_s1 + $0x168] sm:$0xff] }
   0x5   :  { %517 = vmatpush3.msra.mxu1 %v63_v3  ;;  %483 = vmatprep.subr.mxu0 %v46_v4  ;;  %v44_v12 = vld [vmem:[%s1047_s1 + $0xe0] sm:$0xff]  ;;  %v43_v16 = vld [vmem:[%s1047_s1 + $0xd8] sm:$0xff]  ;;  %v42_v20 = vld [vmem:[%s1047_s1 + $0xd0] sm:$0xff]  ;;  %v783_v51 = vsub.s32 %v156_v41, %v158_v42 }
   0x6   :  { %518 = vmatprep.subr.mxu1 %v78_v5  ;;  %484 = vmatpush3.msra.mxu0 %v30_v6  ;;  %v76_v13 = vld [vmem:[%s1047_s1 + $0x1e0] sm:$0xff]  ;;  %v75_v17 = vld [vmem:[%s1047_s1 + $0x1d8] sm:$0xff]  ;;  %v74_v21 = vld [vmem:[%s1047_s1 + $0x1d0] sm:$0xff] }
   0x7   :  { %519 = vmatpush3.msra.mxu1 %v62_v7  ;;  %485 = vmatprep.subr.mxu0 %v45_v8  ;;  %v28_v14 = vld [vmem:[%s1047_s1 + $0x60] sm:$0xff]  ;;  %v27_v18 = vld [vmem:[%s1047_s1 + $0x58] sm:$0xff]  ;;  %v26_v22 = vld [vmem:[%s1047_s1 + $0x50] sm:$0xff] }
   0x8   :  { %520 = vmatprep.subr.mxu1 %v77_v9  ;;  %v60_v15 = vld [vmem:[%s1047_s1 + $0x160] sm:$0xff]  ;;  %486 = vmatpush3.msra.mxu0 %v29_v10  ;;  %v59_v19 = vld [vmem:[%s1047_s1 + $0x158] sm:$0xff]  ;;  %v58_v23 = vld [vmem:[%s1047_s1 + $0x150] sm:$0xff] }
   0x9   :  { %521 = vmatpush3.msra.mxu1 %v61_v11  ;;  %487 = vmatprep.subr.mxu0 %v44_v12  ;;  %v41_v24 = vld [vmem:[%s1047_s1 + $0xc8] sm:$0xff]  ;;  %v40_v28 = vld [vmem:[%s1047_s1 + $0xc0] sm:$0xff]  ;;  %v39_v35 = vld [vmem:[%s1047_s1 + $0xb8] sm:$0xff] }
   0xa   :  { %522 = vmatprep.subr.mxu1 %v76_v13  ;;  %488 = vmatpush3.msra.mxu0 %v28_v14  ;;  %v73_v25 = vld [vmem:[%s1047_s1 + $0x1c8] sm:$0xff]  ;;  %v72_v29 = vld [vmem:[%s1047_s1 + $0x1c0] sm:$0xff]  ;;  %v71_v36 = vld [vmem:[%s1047_s1 + $0x1b8] sm:$0xff] }
   0xb   :  { %523 = vmatpush3.msra.mxu1 %v60_v15  ;;  %489 = vmatprep.subr.mxu0 %v43_v16  ;;  %v25_v26 = vld [vmem:[%s1047_s1 + $0x48] sm:$0xff]  ;;  %v24_v33 = vld [vmem:[%s1047_s1 + $0x40] sm:$0xff]  ;;  %v23_v37 = vld [vmem:[%s1047_s1 + $0x38] sm:$0xff] }
   0xc   :  { %524 = vmatprep.subr.mxu1 %v75_v17  ;;  %490 = vmatpush3.msra.mxu0 %v27_v18  ;;  %v57_v27 = vld [vmem:[%s1047_s1 + $0x148] sm:$0xff]  ;;  %v56_v34 = vld [vmem:[%s1047_s1 + $0x140] sm:$0xff]  ;;  %v55_v38 = vld [vmem:[%s1047_s1 + $0x138] sm:$0xff] }
   0xd   :  { %525 = vmatpush3.msra.mxu1 %v59_v19  ;;  %491 = vmatprep.subr.mxu0 %v42_v20  ;;  %v38_v39 = vld [vmem:[%s1047_s1 + $0xb0] sm:$0xff]  ;;  %v37_v45 = vld [vmem:[%s1047_s1 + $0xa8] sm:$0xff]  ;;  %v36_v49 = vld [vmem:[%s1047_s1 + $0xa0] sm:$0xff] }
   0xe   :  { %526 = vmatprep.subr.mxu1 %v74_v21  ;;  %492 = vmatpush3.msra.mxu0 %v26_v22  ;;  %v70_v40 = vld [vmem:[%s1047_s1 + $0x1b0] sm:$0xff]  ;;  %v69_v46 = vld [vmem:[%s1047_s1 + $0x1a8] sm:$0xff]  ;;  %v68_v50 = vld [vmem:[%s1047_s1 + $0x1a0] sm:$0xff] }
   0xf   :  { %527 = vmatpush3.msra.mxu1 %v58_v23  ;;  %493 = vmatprep.subr.mxu0 %v41_v24  ;;  %v22_v43 = vld [vmem:[%s1047_s1 + $0x30] sm:$0xff]  ;;  %v21_v47 = vld [vmem:[%s1047_s1 + $0x28] sm:$0xff]  ;;  %v20_v52 = vld [vmem:[%s1047_s1 + $0x20] sm:$0xff] }
  0x10   :  { %528 = vmatprep.subr.mxu1 %v73_v25  ;;  %494 = vmatpush3.msra.mxu0 %v25_v26  ;;  %v54_v44 = vld [vmem:[%s1047_s1 + $0x130] sm:$0xff]  ;;  %v53_v48 = vld [vmem:[%s1047_s1 + $0x128] sm:$0xff]  ;;  %v52_v53 = vld [vmem:[%s1047_s1 + $0x120] sm:$0xff] }
  0x11   :  { %529 = vmatpush3.msra.mxu1 %v57_v27  ;;  %495 = vmatprep.subr.mxu0 %v40_v28  ;;  %v14_v54 = vld [vmem:[%s1048_s0] sm:$0xff]  ;;  %v35_v55 = vld [vmem:[%s1047_s1 + $0x98] sm:$0xff]  ;;  %v34_v60 = vld [vmem:[%s1047_s1 + $0x90] sm:$0xff] }
  0x12   :  { %530 = vmatprep.subr.mxu1 %v72_v29  ;;  %496 = vmatpush3.msra.mxu0 %v24_v33  ;;  %v67_v56 = vld [vmem:[%s1047_s1 + $0x198] sm:$0xff]  ;;  %v153_v57 = vcombine.high %v14_v54, %v14_v54  ;;  %v66_v61 = vld [vmem:[%s1047_s1 + $0x190] sm:$0xff]  ;;  %v160_v62 = vrot.slane %v14_v54, %v783_v51  ;;  %v33_v1 = vld [vmem:[%s1047_s1 + $0x88] sm:$0xff] }
  0x13   :  { %531 = vmatpush3.msra.mxu1 %v56_v34  ;;  %497 = vmatprep.subr.mxu0 %v39_v35  ;;  %v19_v58 = vld [vmem:[%s1047_s1 + $0x18] sm:$0xff]  ;;  %v18_v63 = vld [vmem:[%s1047_s1 + $0x10] sm:$0xff]  ;;  %v65_v2 = vld [vmem:[%s1047_s1 + $0x188] sm:$0xff] }
  0x14   :  { %532 = vmatprep.subr.mxu1 %v71_v36  ;;  %498 = vmatpush3.msra.mxu0 %v23_v37  ;;  %v51_v59 = vld [vmem:[%s1047_s1 + $0x118] sm:$0xff]  ;;  %v50_v0 = vld [vmem:[%s1047_s1 + $0x110] sm:$0xff]  ;;  %v167_v3 = vrot.slane %v153_v57, %v783_v51  ;;  %v17_v4 = vld [vmem:[%s1047_s1 + $0x8] sm:$0xff]  ;;  %v168_v8 = vcombine.high %v160_v62, %v160_v62 }
  0x15   :  { %533 = vmatpush3.msra.mxu1 %v55_v38  ;;  %499 = vmatprep.subr.mxu0 %v38_v39  ;;  %v49_v5 = vld [vmem:[%s1047_s1 + $0x108] sm:$0xff]  ;;  %v32_v6 = vld [vmem:[%s1047_s1 + $0x80] sm:$0xff]  ;;  %v111_v12 = vld [vmem:[%s1047_s1 + $0x2f8] sm:$0xff] }
  0x16   :  { %534 = vmatprep.subr.mxu1 %v70_v40  ;;  %500 = vmatpush3.msra.mxu0 %v22_v43  ;;  %v64_v7 = vld [vmem:[%s1047_s1 + $0x180] sm:$0xff]  ;;  %v169_v11 = vcombine.high %v167_v3, %v167_v3  ;;  %v143_v13 = vld [vmem:[%s1047_s1 + $0x3f8] sm:$0xff]  ;;  %v110_v16 = vld [vmem:[%s1047_s1 + $0x2f0] sm:$0xff] }
  0x17   :  { %535 = vmatpush3.msra.mxu1 %v54_v44  ;;  %501 = vmatprep.subr.mxu0 %v37_v45  ;;  %v16_v9 = vld [vmem:[%s1047_s1] sm:$0xff]  ;;  %v95_v14 = vld [vmem:[%s1047_s1 + $0x278] sm:$0xff]  ;;  %v142_v17 = vld [vmem:[%s1047_s1 + $0x3f0] sm:$0xff] }
  0x18   :  { %536 = vmatprep.subr.mxu1 %v69_v46  ;;  %502 = vmatpush3.msra.mxu0 %v21_v47  ;;  %v48_v10 = vld [vmem:[%s1047_s1 + $0x100] sm:$0xff]  ;;  %v127_v15 = vld [vmem:[%s1047_s1 + $0x378] sm:$0xff]  ;;  %v94_v18 = vld [vmem:[%s1047_s1 + $0x270] sm:$0xff] }
  0x19   :  { %537 = vmatpush3.msra.mxu1 %v53_v48  ;;  %503 = vmatprep.subr.mxu0 %v36_v49  ;;  %v126_v19 = vld [vmem:[%s1047_s1 + $0x370] sm:$0xff]  ;;  %v109_v20 = vld [vmem:[%s1047_s1 + $0x2e8] sm:$0xff]  ;;  %v108_v24 = vld [vmem:[%s1047_s1 + $0x2e0] sm:$0xff] }
  0x1a   :  { %538 = vmatprep.subr.mxu1 %v68_v50  ;;  %504 = vmatpush3.msra.mxu0 %v20_v52  ;;  %v141_v21 = vld [vmem:[%s1047_s1 + $0x3e8] sm:$0xff]  ;;  %v140_v25 = vld [vmem:[%s1047_s1 + $0x3e0] sm:$0xff]  ;;  %v107_v28 = vld [vmem:[%s1047_s1 + $0x2d8] sm:$0xff] }
  0x1b   :  { %539 = vmatpush3.msra.mxu1 %v52_v53  ;;  %505 = vmatprep.subr.mxu0 %v35_v55  ;;  %v93_v22 = vld [vmem:[%s1047_s1 + $0x268] sm:$0xff]  ;;  %v92_v26 = vld [vmem:[%s1047_s1 + $0x260] sm:$0xff]  ;;  %v139_v29 = vld [vmem:[%s1047_s1 + $0x3d8] sm:$0xff] }
  0x1c   :  { %540 = vmatprep.subr.mxu1 %v67_v56  ;;  %506 = vmatpush3.msra.mxu0 %v19_v58  ;;  %v125_v23 = vld [vmem:[%s1047_s1 + $0x368] sm:$0xff]  ;;  %v124_v27 = vld [vmem:[%s1047_s1 + $0x360] sm:$0xff]  ;;  %v91_v30 = vld [vmem:[%s1047_s1 + $0x258] sm:$0xff] }
  0x1d   :  { %541 = vmatpush3.msra.mxu1 %v51_v59  ;;  %507 = vmatprep.subr.mxu0 %v34_v60  ;;  %v123_v31 = vld [vmem:[%s1047_s1 + $0x358] sm:$0xff]  ;;  %v106_v32 = vld [vmem:[%s1047_s1 + $0x2d0] sm:$0xff]  ;;  %v105_v36 = vld [vmem:[%s1047_s1 + $0x2c8] sm:$0xff] }
  0x1e   :  { %542 = vmatprep.subr.mxu1 %v66_v61  ;;  %508 = vmatpush3.msra.mxu0 %v18_v63  ;;  %v138_v33 = vld [vmem:[%s1047_s1 + $0x3d0] sm:$0xff]  ;;  %v137_v37 = vld [vmem:[%s1047_s1 + $0x3c8] sm:$0xff]  ;;  %v104_v40 = vld [vmem:[%s1047_s1 + $0x2c0] sm:$0xff] }
  0x1f   :  { %543 = vmatpush3.msra.mxu1 %v50_v0  ;;  %509 = vmatprep.subr.mxu0 %v33_v1  ;;  %v90_v34 = vld [vmem:[%s1047_s1 + $0x250] sm:$0xff]  ;;  %v89_v38 = vld [vmem:[%s1047_s1 + $0x248] sm:$0xff]  ;;  %v136_v41 = vld [vmem:[%s1047_s1 + $0x3c0] sm:$0xff] }
  0x20   :  { %544 = vmatprep.subr.mxu1 %v65_v2  ;;  %510 = vmatpush3.msra.mxu0 %v17_v4  ;;  %v122_v35 = vld [vmem:[%s1047_s1 + $0x350] sm:$0xff]  ;;  %v121_v39 = vld [vmem:[%s1047_s1 + $0x348] sm:$0xff]  ;;  %v88_v42 = vld [vmem:[%s1047_s1 + $0x240] sm:$0xff] }
  0x21   :  { %545 = vmatpush3.msra.mxu1 %v49_v5  ;;  %511 = vmatprep.subr.mxu0 %v32_v6  ;;  %v120_v43 = vld [vmem:[%s1047_s1 + $0x340] sm:$0xff]  ;;  %v103_v44 = vld [vmem:[%s1047_s1 + $0x2b8] sm:$0xff]  ;;  %v102_v48 = vld [vmem:[%s1047_s1 + $0x2b0] sm:$0xff] }
  0x22   :  { %546 = vmatprep.subr.mxu1 %v64_v7  ;;  %512 = vmatpush3.msra.mxu0 %v16_v9  ;;  %v135_v45 = vld [vmem:[%s1047_s1 + $0x3b8] sm:$0xff]  ;;  %v134_v49 = vld [vmem:[%s1047_s1 + $0x3b0] sm:$0xff]  ;;  %v15_v53 = vld [vmem:[%s1048_s0 + $0x8] sm:$0xff] }
  0x23   :  { %259 = vmatprep.mubr.f32.mxu0 %v168_v8  ;;  %547 = vmatpush3.msra.mxu1 %v48_v10  ;;  %v87_v46 = vld [vmem:[%s1047_s1 + $0x238] sm:$0xff]  ;;  %v86_v50 = vld [vmem:[%s1047_s1 + $0x230] sm:$0xff]  ;;  %v101_v54 = vld [vmem:[%s1047_s1 + $0x2a8] sm:$0xff]  ;;  %v170_v60 = vcombine.high %v15_v53, %v15_v53  ;;  %v177_v5 = vrot.slane %v15_v53, %v783_v51 }
  0x24   :  { %260 = vmatmul.mubr.f32.vlgmr.msra.gmra.mxu0 %v160_v62  ;;  %329 = vmatprep.mubr.f32.mxu1 %v169_v11  ;;  %v119_v47 = vld [vmem:[%s1047_s1 + $0x338] sm:$0xff]  ;;  %v118_v52 = vld [vmem:[%s1047_s1 + $0x330] sm:$0xff]  ;;  %v133_v55 = vld [vmem:[%s1047_s1 + $0x3a8] sm:$0xff] }
  0x25   :  { %551 = vmatprep.subr.mxu0 %v111_v12  ;;  %586 = vmatprep.subr.mxu1 %v143_v13  ;;  %v85_v56 = vld [vmem:[%s1047_s1 + $0x228] sm:$0xff]  ;;  %v100_v58 = vld [vmem:[%s1047_s1 + $0x2a0] sm:$0xff]  ;;  %v99_v63 = vld [vmem:[%s1047_s1 + $0x298] sm:$0xff]  ;;  %v184_v8 = vrot.slane %v170_v60, %v783_v51 }
  0x26   :  { %330 = vmatmul.mubr.f32.vlgmr.msra.gmra.mxu1 %v167_v3  ;;  %552 = vmatpush3.msra.mxu0 %v95_v14  ;;  %v117_v57 = vld [vmem:[%s1047_s1 + $0x328] sm:$0xff]  ;;  %v132_v59 = vld [vmem:[%s1047_s1 + $0x3a0] sm:$0xff]  ;;  %v131_v0 = vld [vmem:[%s1047_s1 + $0x398] sm:$0xff]  ;;  %v185_v14 = vcombine.high %v177_v5, %v177_v5 }
  0x27   :  { %587 = vmatpush3.msra.mxu1 %v127_v15  ;;  %553 = vmatprep.subr.mxu0 %v110_v16  ;;  %v84_v61 = vld [vmem:[%s1047_s1 + $0x220] sm:$0xff]  ;;  %v83_v1 = vld [vmem:[%s1047_s1 + $0x218] sm:$0xff]  ;;  %v98_v3 = vld [vmem:[%s1047_s1 + $0x290] sm:$0xff]  ;;  %v186_v16 = vcombine.high %v184_v8, %v184_v8 }
  0x28   :  { %588 = vmatprep.subr.mxu1 %v142_v17  ;;  %554 = vmatpush3.msra.mxu0 %v94_v18  ;;  %v116_v62 = vld [vmem:[%s1047_s1 + $0x320] sm:$0xff]  ;;  %v115_v2 = vld [vmem:[%s1047_s1 + $0x318] sm:$0xff]  ;;  %v130_v4 = vld [vmem:[%s1047_s1 + $0x390] sm:$0xff] }
  0x29   :  { %589 = vmatpush3.msra.mxu1 %v126_v19  ;;  %555 = vmatprep.subr.mxu0 %v109_v20  ;;  %v82_v6 = vld [vmem:[%s1047_s1 + $0x210] sm:$0xff]  ;;  %v97_v9 = vld [vmem:[%s1047_s1 + $0x288] sm:$0xff]  ;;  %v96_v12 = vld [vmem:[%s1047_s1 + $0x280] sm:$0xff] }
  0x2a   :  { %590 = vmatprep.subr.mxu1 %v141_v21  ;;  %556 = vmatpush3.msra.mxu0 %v93_v22  ;;  %v114_v7 = vld [vmem:[%s1047_s1 + $0x310] sm:$0xff]  ;;  %v129_v10 = vld [vmem:[%s1047_s1 + $0x388] sm:$0xff]  ;;  %v128_v13 = vld [vmem:[%s1047_s1 + $0x380] sm:$0xff] }
  0x2b   :  { %591 = vmatpush3.msra.mxu1 %v125_v23  ;;  %557 = vmatprep.subr.mxu0 %v108_v24  ;;  %v81_v11 = vld [vmem:[%s1047_s1 + $0x208] sm:$0xff]  ;;  %v80_v15 = vld [vmem:[%s1047_s1 + $0x200] sm:$0xff] }
  0x2c   :  { %592 = vmatprep.subr.mxu1 %v140_v25  ;;  %558 = vmatpush3.msra.mxu0 %v92_v26  ;;  %v113_v51 = vld [vmem:[%s1047_s1 + $0x308] sm:$0xff]  ;;  %v112_v17 = vld [vmem:[%s1047_s1 + $0x300] sm:$0xff] }
  0x2d   :  { %593 = vmatpush3.msra.mxu1 %v124_v27  ;;  %559 = vmatprep.subr.mxu0 %v107_v28  ;;  %v480_v22 = vld [vmem:[%s1049_s2] ss:$0 sm:$0xff] }
  0x2e   :  { %594 = vmatprep.subr.mxu1 %v139_v29  ;;  %560 = vmatpush3.msra.mxu0 %v91_v30 }
  0x2f   :  { %595 = vmatpush3.msra.mxu1 %v123_v31  ;;  %561 = vmatprep.subr.mxu0 %v106_v32 }
  0x30   :  { %596 = vmatprep.subr.mxu1 %v138_v33  ;;  %562 = vmatpush3.msra.mxu0 %v90_v34 }
  0x31   :  { %597 = vmatpush3.msra.mxu1 %v122_v35  ;;  %563 = vmatprep.subr.mxu0 %v105_v36 }
  0x32   :  { %598 = vmatprep.subr.mxu1 %v137_v37  ;;  %564 = vmatpush3.msra.mxu0 %v89_v38 }
  0x33   :  { %599 = vmatpush3.msra.mxu1 %v121_v39  ;;  %565 = vmatprep.subr.mxu0 %v104_v40 }
  0x34   :  { %600 = vmatprep.subr.mxu1 %v136_v41  ;;  %566 = vmatpush3.msra.mxu0 %v88_v42 }
  0x35   :  { %601 = vmatpush3.msra.mxu1 %v120_v43  ;;  %567 = vmatprep.subr.mxu0 %v103_v44 }
  0x36   :  { %602 = vmatprep.subr.mxu1 %v135_v45  ;;  %568 = vmatpush3.msra.mxu0 %v87_v46 }
  0x37   :  { %603 = vmatpush3.msra.mxu1 %v119_v47  ;;  %569 = vmatprep.subr.mxu0 %v102_v48 }
  0x38   :  { %604 = vmatprep.subr.mxu1 %v134_v49  ;;  %570 = vmatpush3.msra.mxu0 %v86_v50 }
  0x39   :  { %605 = vmatpush3.msra.mxu1 %v118_v52  ;;  %571 = vmatprep.subr.mxu0 %v101_v54 }
  0x3a   :  { %606 = vmatprep.subr.mxu1 %v133_v55  ;;  %572 = vmatpush3.msra.mxu0 %v85_v56 }
  0x3b   :  { %607 = vmatpush3.msra.mxu1 %v117_v57  ;;  %573 = vmatprep.subr.mxu0 %v100_v58 }
  0x3c   :  { %608 = vmatprep.subr.mxu1 %v132_v59  ;;  %574 = vmatpush3.msra.mxu0 %v84_v61 }
  0x3d   :  { %609 = vmatpush3.msra.mxu1 %v116_v62  ;;  %575 = vmatprep.subr.mxu0 %v99_v63 }
  0x3e   :  { %610 = vmatprep.subr.mxu1 %v131_v0  ;;  %576 = vmatpush3.msra.mxu0 %v83_v1 }
  0x3f   :  { %611 = vmatpush3.msra.mxu1 %v115_v2  ;;  %577 = vmatprep.subr.mxu0 %v98_v3 }
  0x40   :  { %612 = vmatprep.subr.mxu1 %v130_v4  ;;  %578 = vmatpush3.msra.mxu0 %v82_v6 }
  0x41   :  { %613 = vmatpush3.msra.mxu1 %v114_v7  ;;  %579 = vmatprep.subr.mxu0 %v97_v9 }
  0x42   :  { %614 = vmatprep.subr.mxu1 %v129_v10  ;;  %580 = vmatpush3.msra.mxu0 %v81_v11 }
  0x43   :  { %615 = vmatpush3.msra.mxu1 %v113_v51  ;;  %581 = vmatprep.subr.mxu0 %v96_v12 }
  0x44   :  { %616 = vmatprep.subr.mxu1 %v128_v13  ;;  %582 = vmatpush3.msra.mxu0 %v80_v15 }
  0x45   :  { %399 = vmatprep.mubr.f32.mxu0 %v185_v14  ;;  %617 = vmatpush3.msra.mxu1 %v112_v17 }
  0x46   :  { %469 = vmatprep.mubr.f32.mxu1 %v186_v16  ;;  %400 = vmatmul.mubr.f32.vlgmr.msra.gmra.mxu0 %v177_v5 }
  0x47   :  { %470 = vmatmul.mubr.f32.vlgmr.msra.gmra.mxu1 %v184_v8 }
  0xe4   :  { %v513_v18 = vpop.f32.mrf.mxu0 }
  0xe6   :  { %v548_v19 = vpop.f32.mrf.mxu1  ;;  %v514_v20 = vpop.f32.mrf.mxu0 }
  0xe7   :  { %v515_v21 = vadd.f32 %v514_v20, %v513_v18 }
  0xe8   :  { %v549_v23 = vpop.f32.mrf.mxu1 }
  0xe9   :  { %v262_v24 = vadd.f32 %v515_v21, %v480_v22  ;;  %v550_v25 = vadd.f32 %v549_v23, %v548_v19 }
  0xeb   :  { %v332_v30 = vadd.f32 %v550_v25, %v262_v24 }
 0x106   :  { %v583_v26 = vpop.f32.mrf.mxu0 }
 0x107   :  { %v618_v27 = vpop.f32.mrf.mxu1 }
 0x108   :  { %v584_v28 = vpop.f32.mrf.mxu0 }
 0x109   :  { %v619_v29 = vpop.f32.mrf.mxu1  ;;  %v585_v31 = vadd.f32 %v584_v28, %v583_v26 }
 0x10a   :  { %v620_v33 = vadd.f32 %v619_v29, %v618_v27 }
 0x10b   :  { %v402_v32 = vadd.f32 %v585_v31, %v332_v30 }
 0x10d   :  { %v472_v34 = vadd.f32 %v620_v33, %v402_v32 }
 0x10f   :  { %475 = vst [vmem:[%s1050_s3] sm:$0x3] %v472_v34 }

// kernel: multi_task_vat_loss.5
= control target key start
LH: loop header
LB: loop body
LE: loop exit
PB: predicated region body
PF: predicated region fallthrough
CT: control target
= control target key end

     0   :  { %v31_v1 = vlaneseq  ;;  %v858_v3 = vmov 1983009808   ;;  %s1356_s0 = inlined_call_operand.vmem [shape: f32[2,1024], index: 0, kind: input, shape index: {}]   ;;  %s1357_s1 = inlined_call_operand.vmem [shape: f32[2,1024], index: 1, kind: input, shape index: {}]   ;;  %s1358_s2 = inlined_call_operand.vmem [shape: f32[2,128], index: 2, kind: input, shape index: {}]   ;;  %s1359_s3 = inlined_call_operand.vmem [shape: f32[1024,128], index: 3, kind: input, shape index: {}]   ;;  %s1360_s4 = inlined_call_operand.vmem [shape: f32[1,128], index: 4, kind: input, shape index: {}]   ;;  %s1361_s5 = inlined_call_operand.hbm [shape: f32[1,1], index: 5, kind: output, shape index: {}]  }
   0x1   :  { %v896_v0 = vld [vmem:[%s1357_s1] sm:$0xff]  ;;  %v29_v4 = vunpack.c.l.s4 %v858_v3 }
   0x2   :  { %v23_v2 = vmul.f32 %v896_v0, %v896_v0 }
   0x3   :  { %10 = vsyncpa [#allocation3], 0  ;;  %v903_v5 = vld [vmem:[%s1357_s1 + $0x8] sm:$0xff]  ;;  %v905_v6 = vshrl.u32 %v31_v1, 7  ;;  %v30_v8 = vunpack.c.0.s8 %v29_v4  ;;  %vm69_vm0 = vcmask 1041408   ;;  %v142_v35 = vld [vmem:[%s1359_s3 + $0xf8] sm:$0xff] }
   0x4   :  { %v27_v7 = vcombine.high %v23_v2, %v23_v2  ;;  %v24_v9 = vmul.f32 %v903_v5, %v903_v5  ;;  %673 = vmatprep.subr.mxu0 %v142_v35  ;;  %v126_v36 = vld [vmem:[%s1359_s3 + $0x78] sm:$0xff]  ;;  %v141_v37 = vld [vmem:[%s1359_s3 + $0xf0] sm:$0xff]  ;;  %v140_v41 = vld [vmem:[%s1359_s3 + $0xe8] sm:$0xff]  ;;  %vm587_vm1 = vcmask 123968   ;;  %vm573_vm4 = vcmask 58368   ;;  %s862_s22 = smov [#allocation2]  }
   0x5   :  { %v910_v10 = vsub.s32 %v30_v8, %v905_v6  ;;  %674 = vmatpush3.msra.mxu0 %v126_v36  ;;  %v174_v38 = vld [vmem:[%s1359_s3 + $0x1f8] sm:$0xff]  ;;  %v125_v39 = vld [vmem:[%s1359_s3 + $0x70] sm:$0xff]  ;;  %v124_v43 = vld [vmem:[%s1359_s3 + $0x68] sm:$0xff]  ;;  %vm651_vm5 = vcmask 0   ;;  %s664_s23 = sshll.u32 %s862_s22, 4  ;;  %s665_s23 = int_to_ptr.vmem [resolvable:$true] %s664_s23 }
   0x6   :  { %v44_v15 = vcombine.high %v24_v9, %v24_v9  ;;  %675 = vmatprep.subr.mxu0 %v141_v37  ;;  %708 = vmatprep.subr.mxu1 %v174_v38  ;;  %v158_v40 = vld [vmem:[%s1359_s3 + $0x178] sm:$0xff]  ;;  %v173_v42 = vld [vmem:[%s1359_s3 + $0x1f0] sm:$0xff]  ;;  %v139_v45 = vld [vmem:[%s1359_s3 + $0xe0] sm:$0xff]  ;;  %s836_s24 = scalar_lea.vmem %s665_s23, 16  ;;  %p841_p1 = scmp.lt.s32.totalorder %s665_s23, %s665_s23 }
   0x7   :  { %v34_v11 = vrot.slane %v23_v2, %v910_v10  ;;  %v41_v12 = vrot.slane %v27_v7, %v910_v10  ;;  %v51_v16 = vrot.slane %v24_v9, %v910_v10  ;;  %676 = vmatpush3.msra.mxu0 %v125_v39  ;;  %709 = vmatpush3.msra.mxu1 %v158_v40  ;;  %v157_v44 = vld [vmem:[%s1359_s3 + $0x170] sm:$0xff]  ;;  %v172_v46 = vld [vmem:[%s1359_s3 + $0x1e8] sm:$0xff]  ;;  %v123_v47 = vld [vmem:[%s1359_s3 + $0x60] sm:$0xff]  ;;  %p837_p0 = scmp.ne.s32.totalorder %s665_s23, %s836_s24 }
   0x8   :  { %v58_v21 = vrot.slane %v44_v15, %v910_v10  ;;  %677 = vmatprep.subr.mxu0 %v140_v41  ;;  %710 = vmatprep.subr.mxu1 %v173_v42  ;;  %v156_v48 = vld [vmem:[%s1359_s3 + $0x168] sm:$0xff]  ;;  %v138_v49 = vld [vmem:[%s1359_s3 + $0xd8] sm:$0xff]  ;;  %v171_v50 = vld [vmem:[%s1359_s3 + $0x1e0] sm:$0xff] }
   0x9   :  { %v42_v13 = vcombine.high %v34_v11, %v34_v11  ;;  %v43_v14 = vcombine.high %v41_v12, %v41_v12  ;;  %v70_v17 = vsel %vm69_vm0, %v34_v11, 0.0  ;;  %v73_v19 = vsel %vm69_vm0, %v41_v12, 0.0  ;;  %678 = vmatpush3.msra.mxu0 %v124_v43  ;;  %711 = vmatpush3.msra.mxu1 %v157_v44  ;;  %v122_v51 = vld [vmem:[%s1359_s3 + $0x58] sm:$0xff]  ;;  %v155_v52 = vld [vmem:[%s1359_s3 + $0x160] sm:$0xff]  ;;  %v137_v53 = vld [vmem:[%s1359_s3 + $0xd0] sm:$0xff] }
   0xa   :  { %v59_v22 = vcombine.high %v51_v16, %v51_v16  ;;  %v77_v25 = vsel %vm69_vm0, %v51_v16, 0.0  ;;  %v60_v27 = vcombine.high %v58_v21, %v58_v21  ;;  %v81_v30 = vsel %vm69_vm0, %v58_v21, 0.0  ;;  %679 = vmatprep.subr.mxu0 %v139_v45  ;;  %712 = vmatprep.subr.mxu1 %v172_v46  ;;  %v170_v54 = vld [vmem:[%s1359_s3 + $0x1d8] sm:$0xff]  ;;  %v121_v55 = vld [vmem:[%s1359_s3 + $0x50] sm:$0xff]  ;;  %v136_v57 = vld [vmem:[%s1359_s3 + $0xc8] sm:$0xff] }
   0xb   :  { %v71_v18 = vsel %vm69_vm0, %v42_v13, 0.0  ;;  %v75_v23 = vsel %vm69_vm0, %v43_v14, 0.0  ;;  %680 = vmatpush3.msra.mxu0 %v123_v47  ;;  %713 = vmatpush3.msra.mxu1 %v156_v48  ;;  %v154_v56 = vld [vmem:[%s1359_s3 + $0x158] sm:$0xff]  ;;  %v169_v58 = vld [vmem:[%s1359_s3 + $0x1d0] sm:$0xff]  ;;  %v120_v59 = vld [vmem:[%s1359_s3 + $0x48] sm:$0xff] }
   0xc   :  { %v72_v20 = vadd.f32 %v71_v18, %v70_v17  ;;  %v79_v28 = vsel %vm69_vm0, %v59_v22, 0.0  ;;  %v83_v32 = vsel %vm69_vm0, %v60_v27, 0.0  ;;  %681 = vmatprep.subr.mxu0 %v138_v49  ;;  %714 = vmatprep.subr.mxu1 %v171_v50  ;;  %v153_v60 = vld [vmem:[%s1359_s3 + $0x150] sm:$0xff]  ;;  %v135_v61 = vld [vmem:[%s1359_s3 + $0xc0] sm:$0xff]  ;;  %v168_v62 = vld [vmem:[%s1359_s3 + $0x1c8] sm:$0xff] }
   0xd   :  { %682 = vmatpush3.msra.mxu0 %v122_v51  ;;  %715 = vmatpush3.msra.mxu1 %v155_v52  ;;  %v119_v63 = vld [vmem:[%s1359_s3 + $0x40] sm:$0xff]  ;;  %v152_v1 = vld [vmem:[%s1359_s3 + $0x148] sm:$0xff]  ;;  %v134_v2 = vld [vmem:[%s1359_s3 + $0xb8] sm:$0xff]  ;;  %v859_v50 = vmov 269488144  }
   0xe   :  { %v74_v24 = vadd.f32 %v73_v19, %v72_v20  ;;  %683 = vmatprep.subr.mxu0 %v137_v53  ;;  %716 = vmatprep.subr.mxu1 %v170_v54  ;;  %v167_v3 = vld [vmem:[%s1359_s3 + $0x1c0] sm:$0xff]  ;;  %v118_v4 = vld [vmem:[%s1359_s3 + $0x38] sm:$0xff]  ;;  %v133_v8 = vld [vmem:[%s1359_s3 + $0xb0] sm:$0xff]  ;;  %v98_v51 = vunpack.c.l.s4 %v859_v50 }
   0xf   :  { %684 = vmatpush3.msra.mxu0 %v121_v55  ;;  %717 = vmatpush3.msra.mxu1 %v154_v56  ;;  %v151_v7 = vld [vmem:[%s1359_s3 + $0x140] sm:$0xff]  ;;  %v166_v9 = vld [vmem:[%s1359_s3 + $0x1b8] sm:$0xff]  ;;  %v117_v11 = vld [vmem:[%s1359_s3 + $0x30] sm:$0xff] }
  0x10   :  { %v76_v26 = vadd.f32 %v75_v23, %v74_v24  ;;  %685 = vmatprep.subr.mxu0 %v136_v57  ;;  %718 = vmatprep.subr.mxu1 %v169_v58  ;;  %v150_v12 = vld [vmem:[%s1359_s3 + $0x138] sm:$0xff]  ;;  %v132_v13 = vld [vmem:[%s1359_s3 + $0xa8] sm:$0xff]  ;;  %v165_v14 = vld [vmem:[%s1359_s3 + $0x1b0] sm:$0xff]  ;;  %v99_v52 = vunpack.c.0.s8 %v98_v51 }
  0x11   :  { %686 = vmatpush3.msra.mxu0 %v120_v59  ;;  %719 = vmatpush3.msra.mxu1 %v153_v60  ;;  %v116_v15 = vld [vmem:[%s1359_s3 + $0x28] sm:$0xff]  ;;  %v149_v16 = vld [vmem:[%s1359_s3 + $0x130] sm:$0xff]  ;;  %v131_v17 = vld [vmem:[%s1359_s3 + $0xa0] sm:$0xff] }
  0x12   :  { %v78_v29 = vadd.f32 %v77_v25, %v76_v26  ;;  %687 = vmatprep.subr.mxu0 %v135_v61  ;;  %720 = vmatprep.subr.mxu1 %v168_v62  ;;  %v164_v18 = vld [vmem:[%s1359_s3 + $0x1a8] sm:$0xff]  ;;  %v115_v19 = vld [vmem:[%s1359_s3 + $0x20] sm:$0xff]  ;;  %v130_v21 = vld [vmem:[%s1359_s3 + $0x98] sm:$0xff]  ;;  %v102_v53 = vsub.s32 %v99_v52, %v905_v6 }
  0x13   :  { %688 = vmatpush3.msra.mxu0 %v119_v63  ;;  %721 = vmatpush3.msra.mxu1 %v152_v1  ;;  %v148_v20 = vld [vmem:[%s1359_s3 + $0x128] sm:$0xff]  ;;  %v163_v22 = vld [vmem:[%s1359_s3 + $0x1a0] sm:$0xff]  ;;  %v114_v23 = vld [vmem:[%s1359_s3 + $0x18] sm:$0xff] }
  0x14   :  { %v80_v31 = vadd.f32 %v79_v28, %v78_v29  ;;  %689 = vmatprep.subr.mxu0 %v134_v2  ;;  %722 = vmatprep.subr.mxu1 %v167_v3  ;;  %v147_v24 = vld [vmem:[%s1359_s3 + $0x120] sm:$0xff]  ;;  %v129_v25 = vld [vmem:[%s1359_s3 + $0x90] sm:$0xff]  ;;  %v162_v26 = vld [vmem:[%s1359_s3 + $0x198] sm:$0xff] }
  0x15   :  { %690 = vmatpush3.msra.mxu0 %v118_v4  ;;  %723 = vmatpush3.msra.mxu1 %v151_v7  ;;  %v113_v27 = vld [vmem:[%s1359_s3 + $0x10] sm:$0xff]  ;;  %v146_v28 = vld [vmem:[%s1359_s3 + $0x118] sm:$0xff]  ;;  %v128_v29 = vld [vmem:[%s1359_s3 + $0x88] sm:$0xff] }
  0x16   :  { %v82_v33 = vadd.f32 %v81_v30, %v80_v31  ;;  %691 = vmatprep.subr.mxu0 %v133_v8  ;;  %724 = vmatprep.subr.mxu1 %v166_v9  ;;  %v161_v30 = vld [vmem:[%s1359_s3 + $0x190] sm:$0xff]  ;;  %v112_v31 = vld [vmem:[%s1359_s3 + $0x8] sm:$0xff]  ;;  %v111_v35 = vld [vmem:[%s1359_s3] sm:$0xff] }
  0x17   :  { %692 = vmatpush3.msra.mxu0 %v117_v11  ;;  %725 = vmatpush3.msra.mxu1 %v150_v12  ;;  %v144_v36 = vld [vmem:[%s1359_s3 + $0x108] sm:$0xff]  ;;  %v159_v37 = vld [vmem:[%s1359_s3 + $0x180] sm:$0xff]  ;;  %v206_v38 = vld [vmem:[%s1359_s3 + $0x2f8] sm:$0xff] }
  0x18   :  { %v84_v34 = vadd.f32 %v83_v32, %v82_v33  ;;  %693 = vmatprep.subr.mxu0 %v132_v13  ;;  %726 = vmatprep.subr.mxu1 %v165_v14  ;;  %v145_v32 = vld [vmem:[%s1359_s3 + $0x110] sm:$0xff]  ;;  %v127_v33 = vld [vmem:[%s1359_s3 + $0x80] sm:$0xff]  ;;  %v238_v40 = vld [vmem:[%s1359_s3 + $0x3f8] sm:$0xff] }
  0x19   :  { %694 = vmatpush3.msra.mxu0 %v116_v15  ;;  %727 = vmatpush3.msra.mxu1 %v149_v16  ;;  %v143_v39 = vld [vmem:[%s1359_s3 + $0x100] sm:$0xff]  ;;  %v108_v57 = vld [vmem:[%s1356_s0 + $0x8] sm:$0xff]  ;;  %v190_v4 = vld [vmem:[%s1359_s3 + $0x278] sm:$0xff] }
  0x1a   :  { %85 = vadd.xlane.f32.xlu0 %v84_v34  ;;  %695 = vmatprep.subr.mxu0 %v131_v17  ;;  %v160_v34 = vld [vmem:[%s1359_s3 + $0x188] sm:$0xff]  ;;  %v1125_v41 = vld [vmem:[%s1358_s2] sm:$0x3]  ;;  %v189_v9 = vld [vmem:[%s1359_s3 + $0x270] sm:$0xff]  ;;  %s840_s2 = scalar_lea.vmem %s665_s23, 32 }
  0x1b   :  { %728 = vmatprep.subr.mxu1 %v164_v18  ;;  %696 = vmatpush3.msra.mxu0 %v115_v19  ;;  %v604_v42 = vsel %vm587_vm1, %v1125_v41, -inf  ;;  %v107_v56 = vld [vmem:[%s1356_s0] sm:$0xff]  ;;  %v222_v11 = vld [vmem:[%s1359_s3 + $0x378] sm:$0xff]  ;;  %v204_v12 = vld [vmem:[%s1359_s3 + $0x2e8] sm:$0xff]  ;;  %p842_p2 = scmp.lt.s32.totalorder %s840_s2, %s836_s24 }
  0x1c   :  { %729 = vmatpush3.msra.mxu1 %v148_v20  ;;  %697 = vmatprep.subr.mxu0 %v130_v21  ;;  %v188_v14 = vld [vmem:[%s1359_s3 + $0x268] sm:$0xff]  ;;  %v221_v15 = vld [vmem:[%s1359_s3 + $0x370] sm:$0xff]  ;;  %v203_v16 = vld [vmem:[%s1359_s3 + $0x2e0] sm:$0xff] }
  0x1d   :  { %730 = vmatprep.subr.mxu1 %v163_v22  ;;  %698 = vmatpush3.msra.mxu0 %v114_v23  ;;  %v236_v17 = vld [vmem:[%s1359_s3 + $0x3e8] sm:$0xff]  ;;  %v187_v18 = vld [vmem:[%s1359_s3 + $0x260] sm:$0xff]  ;;  %v202_v20 = vld [vmem:[%s1359_s3 + $0x2d8] sm:$0xff]  ;;  %p843_p3 = por %p842_p2, %p841_p1 }
  0x1e   :  { %731 = vmatpush3.msra.mxu1 %v147_v24  ;;  %699 = vmatprep.subr.mxu0 %v129_v25  ;;  %v220_v19 = vld [vmem:[%s1359_s3 + $0x368] sm:$0xff]  ;;  %v235_v21 = vld [vmem:[%s1359_s3 + $0x3e0] sm:$0xff]  ;;  %v186_v22 = vld [vmem:[%s1359_s3 + $0x258] sm:$0xff] }
  0x1f   :  { %732 = vmatprep.subr.mxu1 %v162_v26  ;;  %700 = vmatpush3.msra.mxu0 %v113_v27  ;;  %v219_v23 = vld [vmem:[%s1359_s3 + $0x360] sm:$0xff]  ;;  %v201_v24 = vld [vmem:[%s1359_s3 + $0x2d0] sm:$0xff]  ;;  %v234_v25 = vld [vmem:[%s1359_s3 + $0x3d8] sm:$0xff]  ;;  %p844_p4 = pnand %p843_p3, %p837_p0 }
  0x20   :  { %733 = vmatpush3.msra.mxu1 %v146_v28  ;;  %701 = vmatprep.subr.mxu0 %v128_v29  ;;  %v185_v26 = vld [vmem:[%s1359_s3 + $0x250] sm:$0xff]  ;;  %v218_v27 = vld [vmem:[%s1359_s3 + $0x358] sm:$0xff]  ;;  %v200_v28 = vld [vmem:[%s1359_s3 + $0x2c8] sm:$0xff] }
  0x21   :  { %734 = vmatprep.subr.mxu1 %v161_v30  ;;  %702 = vmatpush3.msra.mxu0 %v112_v31  ;;  %v233_v29 = vld [vmem:[%s1359_s3 + $0x3d0] sm:$0xff]  ;;  %v184_v30 = vld [vmem:[%s1359_s3 + $0x248] sm:$0xff]  ;;  %v179_v51 = vld [vmem:[%s1359_s3 + $0x220] sm:$0xff] }
  0x22   :  { %735 = vmatpush3.msra.mxu1 %v145_v32  ;;  %703 = vmatprep.subr.mxu0 %v127_v33  ;;  %v217_v31 = vld [vmem:[%s1359_s3 + $0x350] sm:$0xff]  ;;  %v199_v32 = vld [vmem:[%s1359_s3 + $0x2c0] sm:$0xff]  ;;  %v232_v33 = vld [vmem:[%s1359_s3 + $0x3c8] sm:$0xff] }
  0x23   :  { %736 = vmatprep.subr.mxu1 %v160_v34  ;;  %704 = vmatpush3.msra.mxu0 %v111_v35  ;;  %v183_v34 = vld [vmem:[%s1359_s3 + $0x240] sm:$0xff]  ;;  %v216_v35 = vld [vmem:[%s1359_s3 + $0x348] sm:$0xff] }
  0x24   :  { %737 = vmatpush3.msra.mxu1 %v144_v36  ;;  %743 = vmatprep.subr.mxu0 %v206_v38  ;;  %v198_v36 = vld [vmem:[%s1359_s3 + $0x2b8] sm:$0xff]  ;;  %v228_v50 = vld [vmem:[%s1359_s3 + $0x3a8] sm:$0xff] }
  0x25   :  { %738 = vmatprep.subr.mxu1 %v159_v37  ;;  %605 = vmax.xlane.f32.xlu0 %v604_v42  ;;  %v231_v37 = vld [vmem:[%s1359_s3 + $0x3c0] sm:$0xff]  ;;  %v182_v38 = vld [vmem:[%s1359_s3 + $0x238] sm:$0xff]  ;;  %v212_v52 = vld [vmem:[%s1359_s3 + $0x328] sm:$0xff] }
  0x26   :  { %739 = vmatpush3.msra.mxu1 %v143_v39  ;;  %v215_v39 = vld [vmem:[%s1359_s3 + $0x340] sm:$0xff]  ;;  %v230_v42 = vld [vmem:[%s1359_s3 + $0x3b8] sm:$0xff] }
  0x27   :  { %778 = vmatprep.subr.mxu1 %v238_v40  ;;  %v197_v40 = vld [vmem:[%s1359_s3 + $0x2b0] sm:$0xff] }
  0xa3   :  { %v86_v43 = vpop.xlane.xlu0 %85 }
  0xa4   :  { %822 = vrsqrt.f32 %v86_v43  ;;  %vm89_vm2 = vcmp.eq.f32.partialorder %v86_v43, inf  ;;  %v92_v46 = vand.u32 2147483648, %v86_v43  ;;  %vm91_vm3 = vcmp.eq.f32.partialorder %v86_v43, 0.0 }
  0xb1   :  { %v823_v44 = vpop.eup %822 }
  0xb2   :  { %v88_v45 = vmul.f32 %v823_v44, %v86_v43  ;;  %v214_v44 = vld [vmem:[%s1359_s3 + $0x338] sm:$0xff] }
  0xb4   :  { %v90_v47 = vsel %vm89_vm2, %v86_v43, %v88_v45  ;;  %v181_v43 = vld [vmem:[%s1359_s3 + $0x230] sm:$0xff]  ;;  %v196_v45 = vld [vmem:[%s1359_s3 + $0x2a8] sm:$0xff] }
  0xb5   :  { %v93_v48 = vsel %vm91_vm3, %v92_v46, %v90_v47  ;;  %v229_v46 = vld [vmem:[%s1359_s3 + $0x3b0] sm:$0xff]  ;;  %v180_v47 = vld [vmem:[%s1359_s3 + $0x228] sm:$0xff] }
  0xb6   :  { %v94_v49 = vadd.f32 1e-08, %v93_v48  ;;  %v213_v48 = vld [vmem:[%s1359_s3 + $0x330] sm:$0xff] }
  0xb8   :  { %824 = vrcp.f32 %v94_v49  ;;  %v195_v49 = vld [vmem:[%s1359_s3 + $0x2a0] sm:$0xff] }
  0xc5   :  { %v825_v54 = vpop.eup %824 }
  0xc6   :  { %v103_v55 = vrot.slane %v825_v54, %v102_v53  ;;  %v194_v53 = vld [vmem:[%s1359_s3 + $0x298] sm:$0xff]  ;;  %v227_v54 = vld [vmem:[%s1359_s3 + $0x3a0] sm:$0xff] }
  0xc8   :  { %v105_v58 = vmul.f32 %v103_v55, %v896_v0  ;;  %v106_v59 = vmul.f32 %v103_v55, %v903_v5  ;;  %v205_v5 = vld [vmem:[%s1359_s3 + $0x2f0] sm:$0xff]  ;;  %v178_v55 = vld [vmem:[%s1359_s3 + $0x218] sm:$0xff] }
  0xca   :  { %v109_v60 = vadd.f32 %v107_v56, %v105_v58  ;;  %v110_v61 = vadd.f32 %v108_v57, %v106_v59  ;;  %v211_v56 = vld [vmem:[%s1359_s3 + $0x320] sm:$0xff]  ;;  %v193_v57 = vld [vmem:[%s1359_s3 + $0x290] sm:$0xff]  ;;  %v226_v58 = vld [vmem:[%s1359_s3 + $0x398] sm:$0xff] }
  0xcb   :  { %v177_v59 = vld [vmem:[%s1359_s3 + $0x210] sm:$0xff] }
  0xcc   :  { %v255_v62 = vrot.slane %v109_v60, %v910_v10  ;;  %v248_v63 = vcombine.high %v109_v60, %v109_v60  ;;  %v265_v6 = vcombine.high %v110_v61, %v110_v61  ;;  %v1140_v1 = vrot.slane %v110_v61, %v910_v10  ;;  %v210_v60 = vld [vmem:[%s1359_s3 + $0x318] sm:$0xff]  ;;  %v192_v61 = vld [vmem:[%s1359_s3 + $0x288] sm:$0xff] }
  0xce   :  { %v263_v2 = vcombine.high %v255_v62, %v255_v62  ;;  %v262_v3 = vrot.slane %v248_v63, %v910_v10  ;;  %v1150_v7 = vrot.slane %v265_v6, %v910_v10  ;;  %v280_v8 = vcombine.high %v1140_v1, %v1140_v1  ;;  %v237_v10 = vld [vmem:[%s1359_s3 + $0x3f0] sm:$0xff]  ;;  %v176_v63 = vld [vmem:[%s1359_s3 + $0x208] sm:$0xff] }
  0xcf   :  { %v209_v6 = vld [vmem:[%s1359_s3 + $0x310] sm:$0xff] }
  0xd0   :  { %354 = vmatprep.mubr.f32.mxu0 %v263_v2  ;;  %v264_v0 = vcombine.high %v262_v3, %v262_v3  ;;  %v281_v13 = vcombine.high %v1150_v7, %v1150_v7  ;;  %v191_v2 = vld [vmem:[%s1359_s3 + $0x280] sm:$0xff] }
  0xd1   :  { %355 = vmatmul.mubr.f32.vlgmr.msra.gmra.mxu0 %v255_v62  ;;  %v225_v62 = vld [vmem:[%s1359_s3 + $0x390] sm:$0xff] }
  0xd2   :  { %744 = vmatpush3.msra.mxu0 %v190_v4  ;;  %424 = vmatprep.mubr.f32.mxu1 %v264_v0  ;;  %v175_v4 = vld [vmem:[%s1359_s3 + $0x200] sm:$0xff]  ;;  %v208_v0 = vld [vmem:[%s1359_s3 + $0x308] sm:$0xff] }
  0xd3   :  { %745 = vmatprep.subr.mxu0 %v205_v5  ;;  %494 = vmatprep.mubr.f32.mxu0 %v280_v8  ;;  %v223_v5 = vld [vmem:[%s1359_s3 + $0x380] sm:$0xff] }
  0xd4   :  { %425 = vmatmul.mubr.f32.vlgmr.msra.gmra.mxu1 %v262_v3  ;;  %746 = vmatpush3.msra.mxu0 %v189_v9  ;;  %v224_v3 = vld [vmem:[%s1359_s3 + $0x388] sm:$0xff]  ;;  %v207_v8 = vld [vmem:[%s1359_s3 + $0x300] sm:$0xff]  ;;  %s860_s3 = smov 120  }
  0xd5   :  { %779 = vmatpush3.msra.mxu1 %v222_v11  ;;  %747 = vmatprep.subr.mxu0 %v204_v12 }
  0xd6   :  { %780 = vmatprep.subr.mxu1 %v237_v10  ;;  %564 = vmatprep.mubr.f32.mxu1 %v281_v13  ;;  %v672_v13 = vld [vmem:[%s1360_s4] ss:$0 sm:$0xff] }
  0xd7   :  { %748 = vmatpush3.msra.mxu0 %v188_v14  ;;  %781 = vmatpush3.msra.mxu1 %v221_v15 }
  0xd8   :  { %749 = vmatprep.subr.mxu0 %v203_v16  ;;  %782 = vmatprep.subr.mxu1 %v236_v17 }
  0xd9   :  { %750 = vmatpush3.msra.mxu0 %v187_v18  ;;  %783 = vmatpush3.msra.mxu1 %v220_v19  ;;  %v606_v18 = vpop.xlane.xlu0 %605 }
  0xda   :  { %751 = vmatprep.subr.mxu0 %v202_v20  ;;  %784 = vmatprep.subr.mxu1 %v235_v21 }
  0xdb   :  { %752 = vmatpush3.msra.mxu0 %v186_v22  ;;  %785 = vmatpush3.msra.mxu1 %v219_v23  ;;  %v607_v22 = vsub.f32 %v1125_v41, %v606_v18 }
  0xdc   :  { %753 = vmatprep.subr.mxu0 %v201_v24  ;;  %786 = vmatprep.subr.mxu1 %v234_v25 }
  0xdd   :  { %754 = vmatpush3.msra.mxu0 %v185_v26  ;;  %787 = vmatpush3.msra.mxu1 %v218_v27  ;;  %v608_v26 = vmul.f32 1.442695, %v607_v22 }
  0xde   :  { %755 = vmatprep.subr.mxu0 %v200_v28  ;;  %788 = vmatprep.subr.mxu1 %v233_v29 }
  0xdf   :  { %756 = vmatpush3.msra.mxu0 %v184_v30  ;;  %789 = vmatpush3.msra.mxu1 %v217_v31  ;;  %826 = vpow2.f32 %v608_v26 }
  0xe0   :  { %757 = vmatprep.subr.mxu0 %v199_v32  ;;  %790 = vmatprep.subr.mxu1 %v232_v33 }
  0xe1   :  { %758 = vmatpush3.msra.mxu0 %v183_v34  ;;  %791 = vmatpush3.msra.mxu1 %v216_v35 }
  0xe2   :  { %759 = vmatprep.subr.mxu0 %v198_v36  ;;  %792 = vmatprep.subr.mxu1 %v231_v37 }
  0xe3   :  { %760 = vmatpush3.msra.mxu0 %v182_v38  ;;  %793 = vmatpush3.msra.mxu1 %v215_v39 }
  0xe4   :  { %761 = vmatprep.subr.mxu0 %v197_v40  ;;  %794 = vmatprep.subr.mxu1 %v230_v42 }
  0xe5   :  { %762 = vmatpush3.msra.mxu0 %v181_v43  ;;  %795 = vmatpush3.msra.mxu1 %v214_v44 }
  0xe6   :  { %763 = vmatprep.subr.mxu0 %v196_v45  ;;  %796 = vmatprep.subr.mxu1 %v229_v46 }
  0xe7   :  { %764 = vmatpush3.msra.mxu0 %v180_v47  ;;  %797 = vmatpush3.msra.mxu1 %v213_v48 }
  0xe8   :  { %765 = vmatprep.subr.mxu0 %v195_v49  ;;  %798 = vmatprep.subr.mxu1 %v228_v50 }
  0xe9   :  { %766 = vmatpush3.msra.mxu0 %v179_v51  ;;  %799 = vmatpush3.msra.mxu1 %v212_v52 }
  0xea   :  { %767 = vmatprep.subr.mxu0 %v194_v53  ;;  %800 = vmatprep.subr.mxu1 %v227_v54 }
  0xeb   :  { %768 = vmatpush3.msra.mxu0 %v178_v55  ;;  %801 = vmatpush3.msra.mxu1 %v211_v56 }
  0xec   :  { %769 = vmatprep.subr.mxu0 %v193_v57  ;;  %802 = vmatprep.subr.mxu1 %v226_v58  ;;  %v827_v28 = vpop.eup %826 }
  0xed   :  { %770 = vmatpush3.msra.mxu0 %v177_v59  ;;  %803 = vmatpush3.msra.mxu1 %v210_v60 }
  0xee   :  { %771 = vmatprep.subr.mxu0 %v192_v61  ;;  %804 = vmatprep.subr.mxu1 %v225_v62  ;;  %v861_v61 = vmov 0.0  }
  0xef   :  { %772 = vmatpush3.msra.mxu0 %v176_v63  ;;  %805 = vmatpush3.msra.mxu1 %v209_v6  ;;  %652 = vst.msk [vmem:[#allocation2] sm:$0x1] %vm651_vm5, %v861_v61 }
  0xf0   :  { %773 = vmatprep.subr.mxu0 %v191_v2  ;;  %806 = vmatprep.subr.mxu1 %v224_v3 }
  0xf1   :  { %774 = vmatpush3.msra.mxu0 %v175_v4  ;;  %807 = vmatpush3.msra.mxu1 %v208_v0 }
  0xf2   :  { %495 = vmatmul.mubr.f32.vlgmr.msra.gmra.mxu0 %v1140_v1  ;;  %808 = vmatprep.subr.mxu1 %v223_v5 }
  0xf3   :  { %809 = vmatpush3.msra.mxu1 %v207_v8 }
  0xf4   :  { %565 = vmatmul.mubr.f32.vlgmr.msra.gmra.mxu1 %v1150_v7 }
  0xf6   :  { %v653_v5 = vld [vmem:[#allocation2] sm:$0x1] }
 0x191   :  { %v705_v9 = vpop.f32.mrf.mxu0 }
 0x193   :  { %v706_v11 = vpop.f32.mrf.mxu0 }
 0x194   :  { %v740_v12 = vpop.f32.mrf.mxu1  ;;  %v707_v10 = vadd.f32 %v706_v11, %v705_v9 }
 0x196   :  { %v741_v14 = vpop.f32.mrf.mxu1  ;;  %v357_v15 = vadd.f32 %v707_v10, %v672_v13 }
 0x197   :  { %v742_v16 = vadd.f32 %v741_v14, %v740_v12 }
 0x199   :  { %v427_v1 = vadd.f32 %v742_v16, %v357_v15 }
 0x1b2   :  { %v775_v17 = vpop.f32.mrf.mxu0 }
 0x1b4   :  { %v776_v19 = vpop.f32.mrf.mxu0  ;;  %v810_v20 = vpop.f32.mrf.mxu1 }
 0x1b5   :  { %v777_v21 = vadd.f32 %v776_v19, %v775_v17 }
 0x1b6   :  { %v811_v7 = vpop.f32.mrf.mxu1 }
 0x1b7   :  { %v497_v23 = vadd.f32 %v777_v21, %v427_v1  ;;  %v812_v24 = vadd.f32 %v811_v7, %v810_v20 }
 0x1b9   :  { %v567_v25 = vadd.f32 %v812_v24, %v497_v23 }
 0x1bb   :  { %v588_v27 = vsel %vm587_vm1, %v567_v25, -inf  ;;  %v571_v35 = vsub.f32 %v567_v25, %v1125_v41 }
 0x1bc   :  { %589 = vmax.xlane.f32.xlu1 %v588_v27 }
 0x1bd   :  { %v572_v38 = vmul.f32 %v571_v35, %v571_v35 }
 0x1bf   :  { %v574_v39 = vsel %vm573_vm4, %v572_v38, 0.0 }
 0x1cd   :  { %611 = vrot.lane.b32.xlu1 %v827_v28, %s860_s3 }
 0x245   :  { %v590_v29 = vpop.xlane.xlu1 %589 }
 0x246   :  { %v591_v30 = vsub.f32 %v567_v25, %v590_v29 }
 0x248   :  { %v592_v31 = vmul.f32 1.442695, %v591_v30 }
 0x249   :  { %v612_v32 = vpop.permute.xlu1 %611 }
 0x24a   :  { %828 = vpow2.f32 %v592_v31  ;;  %v614_v33 = vsel %vm573_vm4, %v612_v32, 0.0 }
 0x24b   :  { %615 = vadd.xlane.f32.xlu1 %v614_v33 }
 0x257   :  { %v829_v34 = vpop.eup %828 }
 0x258   :  { %595 = vrot.lane.b32.xlu0 %v829_v34, %s860_s3 }
 0x2ca   :  { %v596_v36 = vpop.permute.xlu0 %595 }
 0x2cb   :  { %v598_v37 = vsel %vm573_vm4, %v596_v36, 0.0 }
 0x2cc   :  { %599 = vadd.xlane.f32.xlu0 %v598_v37 }
 0x2d0   :  { %575 = vadd.xlane.f32.xlu0 %v574_v39 }
 0x2d4   :  { %v616_v40 = vpop.xlane.xlu1 %615 }
 0x2d5   :  { %830 = vlog2.f32 %v616_v40 }
 0x2e2   :  { %v831_v42 = vpop.eup %830 }
 0x2e3   :  { %v618_v43 = vmul.f32 0.6931472, %v831_v42 }
 0x2e5   :  { %v619_v44 = vsub.f32 %v607_v22, %v618_v43 }
 0x2e7   :  { %v620_v46 = vmul.f32 1.442695, %v619_v44 }
 0x355   :  { %v600_v45 = vpop.xlane.xlu0 %599 }
 0x356   :  { %832 = vlog2.f32 %v600_v45 }
 0x357   :  { %834 = vpow2.f32 %v620_v46 }
 0x359   :  { %v576_v47 = vpop.xlane.xlu0 %575 }
 0x35a   :  { %v577_v48 = vrot.slane %v576_v47, 4 }
 0x35c   :  { %v578_v41 = vadd.f32 %v577_v48, %v576_v47 }
 0x35e   :  { %v579_v49 = vrot.slane %v578_v41, 2 }
 0x360   :  { %v580_v50 = vadd.f32 %v579_v49, %v578_v41 }
 0x362   :  { %v581_v51 = vrot.slane %v580_v50, 1 }
 0x363   :  { %v833_v52 = vpop.eup %832 }
 0x364   :  { %v602_v53 = vmul.f32 0.6931472, %v833_v52  ;;  %v582_v54 = vadd.f32 %v581_v51, %v580_v50  ;;  %v835_v57 = vpop.eup %834 }
 0x366   :  { %v603_v55 = vsub.f32 %v591_v30, %v602_v53  ;;  %813 = vpush %v582_v54 }
 0x368   :  { %v622_v56 = vsub.f32 %v619_v44, %v603_v55 }
 0x36a   :  { %v623_v58 = vmul.f32 %v835_v57, %v622_v56 }
 0x36c   :  { %625 = vrot.lane.b32.xlu1 %v623_v58, %s860_s3 }
 0x397   :  { %s814_s4 = spop %813 }
 0x398   :  { %s586_s16 = smul.f32 5.0, %s814_s4 }
 0x39a   :  { %s638_s17 = smul.f32 0.3, %s586_s16 }
 0x39c   :  { %s641_s20 = smul.f32 0.0625, %s638_s17 }
 0x3de   :  { %v626_v59 = vpop.permute.xlu1 %625 }
 0x3df   :  { %v628_v60 = vsel %vm573_vm4, %v626_v59, 0.0 }
 0x3e0   :  { %629 = vadd.xlane.f32.xlu0 %v628_v60 }
 0x469   :  { %v630_v62 = vpop.xlane.xlu0 %629 }
 0x46a   :  { %v631_v63 = vrot.slane %v630_v62, 4 }
 0x46c   :  { %v632_v6 = vadd.f32 %v631_v63, %v630_v62 }
 0x46e   :  { %v633_v2 = vrot.slane %v632_v6, 2 }
 0x470   :  { %v634_v3 = vadd.f32 %v633_v2, %v632_v6 }
 0x472   :  { %v635_v4 = vrot.slane %v634_v3, 1 }
 0x474   :  { %v636_v0 = vadd.f32 %v635_v4, %v634_v3 }
 0x476   :  { %815 = vpush %v636_v0 }
 0x4a7   :  { %s816_s18 = spop %815 }
 0x4a8   :  { %s642_s19 = smul.f32 0.7, %s816_s18 }
 0x4aa   :  { %s645_s21 = smul.f32 0.5, %s642_s19 }
 0x4ac   :  { %s646_s1 = sadd.f32 %s645_s21, %s641_s20 }
 0x4ae   :  { %v654_v8 = vstv %s646_s1 }
 0x4af   :  { %v655_v9 = vadd.f32 %v654_v8, %v653_v5 }
 0x4b1   :  { %657 = vst.msk [vmem:[#allocation2] sm:$0x1] %vm651_vm5, %v655_v9 }
 0x4b2   :  { %847 = shalt.err (!%p844_p4)
}
 0x4b3   :  { %667 = dma.vmem_to_hbm [thread:$0]  %s665_s23, 16, %s1361_s5, [#allocation3]  }
 0x4b4   :  { %856 = dma.done.wait [#allocation3], 16  }
 0x4b5   :  { %857 = vsyncadd [#allocation3], 4294967280 }
 0x4b6   :  { %671 = vsyncpa [#allocation3], 1 }

</bundles_post_ra>
